<compile_context>
chip_gen: v5e
topology: v5e:2x2
jax: 0.10.0
libtpu: 0.0.40
codegen_flags: <defaults>
</compile_context>

<pallas_src>
import jax
import jax.numpy as jnp
from jax.experimental import pallas as pl
from jax.experimental.pallas import tpu as pltpu

INPUT_DIM = 64
ACTION_DIM = 32
HIDDEN_DIMS = [1024, 512, 32]
LANE = 128  # lane-padded width for the narrow (32-wide) tail tensors


def _action_head_kernel(x_ref,
                        w1_ref, b1_ref,
                        w2_ref, b2_ref,
                        w3_ref, b3_ref,
                        w4_ref, b4_ref,
                        o_ref):
    """Fused 4-layer MLP forward: (Linear+ReLU) x3 + Linear.

    Dots run in the input compute dtype (bf16 by default) with f32 accumulation.
    Bias-add / ReLU stay in f32 before the bf16 down-cast (important on v5e,
    whose VPU has no bf16 VALU path); they co-issue on the VPU while the MXU is
    busy.  Layer-3/4 operands arrive pre-padded to 128 lanes, so all stores are
    lane-dense.
    """
    compute_dtype = x_ref.dtype
    h = x_ref[...]

    # layer 1: 64 -> 1024, ReLU   (K=64 left unpadded: one MXU K-pass regardless)
    h = jnp.dot(h, w1_ref[...], preferred_element_type=jnp.float32) + b1_ref[...]
    h = jnp.maximum(h, 0.0).astype(compute_dtype)

    # layer 2: 1024 -> 512, ReLU  (dominant matmul, ~86% of FLOPs)
    h = jnp.dot(h, w2_ref[...], preferred_element_type=jnp.float32) + b2_ref[...]
    h = jnp.maximum(h, 0.0).astype(compute_dtype)

    # layer 3: 512 -> 128 (zero-padded from 32), ReLU; padded lanes stay exactly 0
    h = jnp.dot(h, w3_ref[...], preferred_element_type=jnp.float32) + b3_ref[...]
    h = jnp.maximum(h, 0.0).astype(compute_dtype)

    # output layer: 128 -> 128 (zero-padded from 32x32), no activation, f32 store
    out = jnp.dot(h, w4_ref[...], preferred_element_type=jnp.float32) + b4_ref[...]
    o_ref[...] = out.astype(o_ref.dtype)


def _pad2d(a, rows, cols):
    """Zero-pad a 2-D array up to (rows, cols)."""
    return jnp.pad(a, ((0, rows - a.shape[0]), (0, cols - a.shape[1])))


def action_head_forward(x, params, *, batch_tile=1024,
                        compute_dtype=jnp.bfloat16,
                        vmem_limit_bytes=None):
    """x: [B, INPUT_DIM] f32; params: list of (W [in,out], b [out]) per layer."""
    B, D = x.shape
    assert D == INPUT_DIM

    (w1, b1), (w2, b2), (w3, b3), (w4, b4) = params

    # ---- batch-tile / grid selection -------------------------------------
    # bf16 native tile is (16, 128), so keep tiles multiples of 16 rows.
    if B <= 128:
        # Tiny batch: one grid step (not worth splitting across cores).
        nsteps = 1
        tile = max(16, 16 * pl.cdiv(B, 16))
    elif B <= batch_tile:
        # Mid-size batch: always >= 2 steps so v7x megacore can shard the grid.
        nsteps = 2
        tile = max(16, 16 * pl.cdiv(pl.cdiv(B, 2), 16))
    else:
        # Large batch: big tiles to amortize per-step overhead; even step count
        # keeps the two v7x TensorCores balanced.
        nsteps = pl.cdiv(B, batch_tile)
        nsteps += nsteps % 2
        tile = max(16, 16 * pl.cdiv(pl.cdiv(B, nsteps), 16))

    B_pad = nsteps * tile
    x_p = x if B_pad == B else jnp.pad(x, ((0, B_pad - B), (0, 0)))

    # ---- operand prep ------------------------------------------------------
    # bf16 operands (MXU peak + half the weight DMA); f32 biases / accumulation.
    x_p = x_p.astype(compute_dtype)
    w1c = w1.astype(compute_dtype)
    w2c = w2.astype(compute_dtype)
    # Lane-pad the narrow tail: exact because ReLU(0+0)=0 and zero rows of W4
    # multiply the zero-padded lanes of h3.
    w3c = _pad2d(w3, w3.shape[0], LANE).astype(compute_dtype)            # [512,128]
    w4c = _pad2d(w4, LANE, LANE).astype(compute_dtype)                   # [128,128]
    b1r = b1.reshape(1, -1).astype(jnp.float32)
    b2r = b2.reshape(1, -1).astype(jnp.float32)
    b3r = _pad2d(b3.reshape(1, -1), 1, LANE).astype(jnp.float32)         # [1,128]
    b4r = _pad2d(b4.reshape(1, -1), 1, LANE).astype(jnp.float32)         # [1,128]

    # ---- VMEM budget ------------------------------------------------------
    if vmem_limit_bytes is None:
        # ~12 KiB of f32/bf16 intermediates per batch row + ~4 MiB of weights /
        # double-buffered IO, with headroom; capped at v7x's 64 MiB physical.
        per_row = 12 * 1024
        vmem_limit_bytes = min(64 * 1024 * 1024,
                               max(32 * 1024 * 1024,
                                   int(1.5 * tile * per_row) + (8 << 20)))

    grid = (nsteps,)

    def resident_spec(shape):
        # Whole array resident in VMEM; its block index never changes across the
        # grid, so single-buffer it (double-buffering would be pure VMEM waste).
        return pl.BlockSpec(shape, lambda i: (0,) * len(shape),
                            pipeline_mode=pl.Buffered(1))

    in_specs = [
        pl.BlockSpec((tile, INPUT_DIM), lambda i: (i, 0)),   # x batch tile
        resident_spec(w1c.shape), resident_spec(b1r.shape),
        resident_spec(w2c.shape), resident_spec(b2r.shape),
        resident_spec(w3c.shape), resident_spec(b3r.shape),
        resident_spec(w4c.shape), resident_spec(b4r.shape),
    ]
    # Lane-dense (tile, 128) f32 output slab; the caller slices [:, :ACTION_DIM].
    out_spec = pl.BlockSpec((tile, LANE), lambda i: (i, 0))

    out = pl.pallas_call(
        _action_head_kernel,
        out_shape=jax.ShapeDtypeStruct((B_pad, LANE), jnp.float32),
        grid_spec=pltpu.PrefetchScalarGridSpec(
            num_scalar_prefetch=0,
            grid=grid,
            in_specs=in_specs,
            out_specs=out_spec,
        ),
        compiler_params=pltpu.CompilerParams(
            dimension_semantics=("parallel",),       # megacore-shard batch tiles
            vmem_limit_bytes=vmem_limit_bytes,
        ),
    )(x_p, w1c, b1r, w2c, b2r, w3c, b3r, w4c, b4r)

    return out[:B, :ACTION_DIM]


def init_params(key):
    """Deterministic init mimicking nn.Linear (uniform(-1/sqrt(in), 1/sqrt(in)))."""
    dims = [INPUT_DIM] + HIDDEN_DIMS + [ACTION_DIM]
    params = []
    for i in range(len(dims) - 1):
        key, kw, kb = jax.random.split(key, 3)
        fan_in, fan_out = dims[i], dims[i + 1]
        bound = 1.0 / jnp.sqrt(fan_in)
        # stored directly as [in, out] (PyTorch weight already transposed)
        W = jax.random.uniform(kw, (fan_in, fan_out), jnp.float32, -bound, bound)
        b = jax.random.uniform(kb, (fan_out,), jnp.float32, -bound, bound)
        params.append((W, b))
    return params


def reference_forward(x, params, compute_dtype=jnp.float32):
    """Pure-JAX reference; compute_dtype=bf16 mirrors the kernel's precision."""
    h = x.astype(compute_dtype)
    for i, (W, b) in enumerate(params):
        h = jnp.dot(h, W.astype(compute_dtype),
                    preferred_element_type=jnp.float32) + b.astype(jnp.float32)
        if i < len(params) - 1:
            h = jnp.maximum(h, 0.0).astype(compute_dtype)
    return h.astype(jnp.float32)


if __name__ == "__main__":
    key = jax.random.PRNGKey(0)
    key, kx = jax.random.split(key)
    params = init_params(key)

    # Small batch: runs as a single 16-row grid step (sublane-aligned for bf16).
    B = 4
    x = jax.random.normal(kx, (B, INPUT_DIM), jnp.float32)
    out = jax.block_until_ready(action_head_forward(x, params))
    assert out.shape == (B, ACTION_DIM)

    ref_matched = reference_forward(x, params, compute_dtype=jnp.bfloat16)
    ref_f32 = reference_forward(x, params, compute_dtype=jnp.float32)
    assert jnp.allclose(out, ref_matched, atol=5e-3, rtol=5e-3), \
        "mismatch vs precision-matched reference"
    assert jnp.allclose(out, ref_f32, atol=5e-2, rtol=5e-2), \
        "mismatch vs f32 reference (bf16 precision drift too large)"

    # Ragged mid-size batch: exercises the 2-step (megacore) path + zero-padding.
    B2 = 300
    key, kx2 = jax.random.split(key)
    x2 = jax.random.normal(kx2, (B2, INPUT_DIM), jnp.float32)
    out2 = jax.block_until_ready(action_head_forward(x2, params))
    ref2 = reference_forward(x2, params, compute_dtype=jnp.bfloat16)
    assert out2.shape == (B2, ACTION_DIM)
    assert jnp.allclose(out2, ref2, atol=5e-3, rtol=5e-3), \
        "mismatch vs reference on ragged batch"

    print("KERNEL_OK")
</pallas_src>

<mosaic_0001>
module attributes {stable_mosaic.version = 11 : i64} {
  func.func @_action_head_kernel(%arg0: i32, %arg1: memref<16x64xbf16, #tpu.memory_space<vmem>>, %arg2: memref<64x1024xbf16, #tpu.memory_space<vmem>>, %arg3: memref<1x1024xf32, #tpu.memory_space<vmem>>, %arg4: memref<1024x512xbf16, #tpu.memory_space<vmem>>, %arg5: memref<1x512xf32, #tpu.memory_space<vmem>>, %arg6: memref<512x128xbf16, #tpu.memory_space<vmem>>, %arg7: memref<1x128xf32, #tpu.memory_space<vmem>>, %arg8: memref<128x128xbf16, #tpu.memory_space<vmem>>, %arg9: memref<1x128xf32, #tpu.memory_space<vmem>>, %arg10: memref<16x128xf32, #tpu.memory_space<vmem>>) attributes {dimension_semantics = [#tpu.dimension_semantics<parallel>], iteration_bounds = array<i64: 1>, scalar_prefetch = 0 : i64, scratch_operands = 0 : i64, tpu.core_type = #tpu.core_type<tc>, window_params = [{transform_indices = @transform_0, window_bounds = array<i64: 16, 64>}, {pipeline_mode = #tpu.pipeline_mode<synchronous>, transform_indices = @transform_1, window_bounds = array<i64: 64, 1024>}, {pipeline_mode = #tpu.pipeline_mode<synchronous>, transform_indices = @transform_2, window_bounds = array<i64: 1, 1024>}, {pipeline_mode = #tpu.pipeline_mode<synchronous>, transform_indices = @transform_3, window_bounds = array<i64: 1024, 512>}, {pipeline_mode = #tpu.pipeline_mode<synchronous>, transform_indices = @transform_4, window_bounds = array<i64: 1, 512>}, {pipeline_mode = #tpu.pipeline_mode<synchronous>, transform_indices = @transform_5, window_bounds = array<i64: 512, 128>}, {pipeline_mode = #tpu.pipeline_mode<synchronous>, transform_indices = @transform_6, window_bounds = array<i64: 1, 128>}, {pipeline_mode = #tpu.pipeline_mode<synchronous>, transform_indices = @transform_7, window_bounds = array<i64: 128, 128>}, {pipeline_mode = #tpu.pipeline_mode<synchronous>, transform_indices = @transform_8, window_bounds = array<i64: 1, 128>}, {transform_indices = @transform_9, window_bounds = array<i64: 16, 128>}]} {
    %c0 = arith.constant 0 : index
    %c0_0 = arith.constant 0 : index
    %0 = vector.load %arg1[%c0, %c0_0] : memref<16x64xbf16, #tpu.memory_space<vmem>>, vector<16x64xbf16>
    %c0_1 = arith.constant 0 : index
    %c0_2 = arith.constant 0 : index
    %1 = vector.load %arg2[%c0_1, %c0_2] : memref<64x1024xbf16, #tpu.memory_space<vmem>>, vector<64x1024xbf16>
    %cst = arith.constant dense<0.000000e+00> : vector<16x1024xf32>
    %2 = tpu.matmul %0, %1, %cst {dimension_numbers = #tpu.dot_dimension_numbers<[1], [0], [0], [1], [0, 0, 1, 1], [], []>} : vector<16x64xbf16>, vector<64x1024xbf16>, vector<16x1024xf32> -> vector<16x1024xf32>
    %c0_3 = arith.constant 0 : index
    %c0_4 = arith.constant 0 : index
    %3 = vector.load %arg3[%c0_3, %c0_4] : memref<1x1024xf32, #tpu.memory_space<vmem>>, vector<1x1024xf32>
    %4 = vector.broadcast %3 : vector<1x1024xf32> to vector<16x1024xf32>
    %5 = arith.addf %2, %4 : vector<16x1024xf32>
    %cst_5 = arith.constant 0.000000e+00 : f32
    %6 = vector.broadcast %cst_5 : f32 to vector<16x1024xf32>
    %7 = arith.maximumf %5, %6 : vector<16x1024xf32>
    %8 = arith.truncf %7 : vector<16x1024xf32> to vector<16x1024xbf16>
    %c0_6 = arith.constant 0 : index
    %c0_7 = arith.constant 0 : index
    %9 = vector.load %arg4[%c0_6, %c0_7] : memref<1024x512xbf16, #tpu.memory_space<vmem>>, vector<1024x512xbf16>
    %cst_8 = arith.constant dense<0.000000e+00> : vector<16x512xf32>
    %10 = tpu.matmul %8, %9, %cst_8 {dimension_numbers = #tpu.dot_dimension_numbers<[1], [0], [0], [1], [0, 0, 1, 1], [], []>} : vector<16x1024xbf16>, vector<1024x512xbf16>, vector<16x512xf32> -> vector<16x512xf32>
    %c0_9 = arith.constant 0 : index
    %c0_10 = arith.constant 0 : index
    %11 = vector.load %arg5[%c0_9, %c0_10] : memref<1x512xf32, #tpu.memory_space<vmem>>, vector<1x512xf32>
    %12 = vector.broadcast %11 : vector<1x512xf32> to vector<16x512xf32>
    %13 = arith.addf %10, %12 : vector<16x512xf32>
    %cst_11 = arith.constant 0.000000e+00 : f32
    %14 = vector.broadcast %cst_11 : f32 to vector<16x512xf32>
    %15 = arith.maximumf %13, %14 : vector<16x512xf32>
    %16 = arith.truncf %15 : vector<16x512xf32> to vector<16x512xbf16>
    %c0_12 = arith.constant 0 : index
    %c0_13 = arith.constant 0 : index
    %17 = vector.load %arg6[%c0_12, %c0_13] : memref<512x128xbf16, #tpu.memory_space<vmem>>, vector<512x128xbf16>
    %cst_14 = arith.constant dense<0.000000e+00> : vector<16x128xf32>
    %18 = tpu.matmul %16, %17, %cst_14 {dimension_numbers = #tpu.dot_dimension_numbers<[1], [0], [0], [1], [0, 0, 1, 1], [], []>} : vector<16x512xbf16>, vector<512x128xbf16>, vector<16x128xf32> -> vector<16x128xf32>
    %c0_15 = arith.constant 0 : index
    %c0_16 = arith.constant 0 : index
    %19 = vector.load %arg7[%c0_15, %c0_16] : memref<1x128xf32, #tpu.memory_space<vmem>>, vector<1x128xf32>
    %20 = vector.broadcast %19 : vector<1x128xf32> to vector<16x128xf32>
    %21 = arith.addf %18, %20 : vector<16x128xf32>
    %cst_17 = arith.constant 0.000000e+00 : f32
    %22 = vector.broadcast %cst_17 : f32 to vector<16x128xf32>
    %23 = arith.maximumf %21, %22 : vector<16x128xf32>
    %24 = arith.truncf %23 : vector<16x128xf32> to vector<16x128xbf16>
    %c0_18 = arith.constant 0 : index
    %c0_19 = arith.constant 0 : index
    %25 = vector.load %arg8[%c0_18, %c0_19] : memref<128x128xbf16, #tpu.memory_space<vmem>>, vector<128x128xbf16>
    %cst_20 = arith.constant dense<0.000000e+00> : vector<16x128xf32>
    %26 = tpu.matmul %24, %25, %cst_20 {dimension_numbers = #tpu.dot_dimension_numbers<[1], [0], [0], [1], [0, 0, 1, 1], [], []>} : vector<16x128xbf16>, vector<128x128xbf16>, vector<16x128xf32> -> vector<16x128xf32>
    %c0_21 = arith.constant 0 : index
    %c0_22 = arith.constant 0 : index
    %27 = vector.load %arg9[%c0_21, %c0_22] : memref<1x128xf32, #tpu.memory_space<vmem>>, vector<1x128xf32>
    %28 = vector.broadcast %27 : vector<1x128xf32> to vector<16x128xf32>
    %29 = arith.addf %26, %28 : vector<16x128xf32>
    %c0_23 = arith.constant 0 : index
    %c0_24 = arith.constant 0 : index
    %30 = vector.load %arg10[%c0_23, %c0_24] : memref<16x128xf32, #tpu.memory_space<vmem>>, vector<16x128xf32>
    tpu.vector_store %arg10[%c0_23, %c0_24], %29 {strides = array<i32>} : memref<16x128xf32, #tpu.memory_space<vmem>>, vector<16x128xf32>,
    return
  }
  func.func @transform_0(%arg0: i32) -> (i32, i32) {
    %c0_i32 = arith.constant 0 : i32
    %c0_i32_0 = arith.constant 0 : i32
    return %arg0, %c0_i32 : i32, i32
  }
  func.func @transform_1(%arg0: i32) -> (i32, i32) {
    %c0_i32 = arith.constant 0 : i32
    %c0_i32_0 = arith.constant 0 : i32
    %c0_i32_1 = arith.constant 0 : i32
    return %c0_i32, %c0_i32_0 : i32, i32
  }
  func.func @transform_2(%arg0: i32) -> (i32, i32) {
    %c0_i32 = arith.constant 0 : i32
    %c0_i32_0 = arith.constant 0 : i32
    %c0_i32_1 = arith.constant 0 : i32
    return %c0_i32, %c0_i32_0 : i32, i32
  }
  func.func @transform_3(%arg0: i32) -> (i32, i32) {
    %c0_i32 = arith.constant 0 : i32
    %c0_i32_0 = arith.constant 0 : i32
    %c0_i32_1 = arith.constant 0 : i32
    return %c0_i32, %c0_i32_0 : i32, i32
  }
  func.func @transform_4(%arg0: i32) -> (i32, i32) {
    %c0_i32 = arith.constant 0 : i32
    %c0_i32_0 = arith.constant 0 : i32
    %c0_i32_1 = arith.constant 0 : i32
    return %c0_i32, %c0_i32_0 : i32, i32
  }
  func.func @transform_5(%arg0: i32) -> (i32, i32) {
    %c0_i32 = arith.constant 0 : i32
    %c0_i32_0 = arith.constant 0 : i32
    %c0_i32_1 = arith.constant 0 : i32
    return %c0_i32, %c0_i32_0 : i32, i32
  }
  func.func @transform_6(%arg0: i32) -> (i32, i32) {
    %c0_i32 = arith.constant 0 : i32
    %c0_i32_0 = arith.constant 0 : i32
    %c0_i32_1 = arith.constant 0 : i32
    return %c0_i32, %c0_i32_0 : i32, i32
  }
  func.func @transform_7(%arg0: i32) -> (i32, i32) {
    %c0_i32 = arith.constant 0 : i32
    %c0_i32_0 = arith.constant 0 : i32
    %c0_i32_1 = arith.constant 0 : i32
    return %c0_i32, %c0_i32_0 : i32, i32
  }
  func.func @transform_8(%arg0: i32) -> (i32, i32) {
    %c0_i32 = arith.constant 0 : i32
    %c0_i32_0 = arith.constant 0 : i32
    %c0_i32_1 = arith.constant 0 : i32
    return %c0_i32, %c0_i32_0 : i32, i32
  }
  func.func @transform_9(%arg0: i32) -> (i32, i32) {
    %c0_i32 = arith.constant 0 : i32
    %c0_i32_0 = arith.constant 0 : i32
    return %arg0, %c0_i32 : i32, i32
  }
}

</mosaic_0001>

<bundles_post_ra>
// kernel: tpu_custom_call.1
= control target key start
LH: loop header
LB: loop body
LE: loop exit
PB: predicated region body
PF: predicated region fallthrough
CT: control target
= control target key end

     0   :  { %14 = vsyncpa [#allocation3], 0  ;;  %s5017_s0 = inlined_call_operand.hbm [shape: bf16[16,64], index: 0, kind: input, shape index: {}]   ;;  %s5018_s1 = inlined_call_operand.hbm [shape: bf16[64,1024], index: 1, kind: input, shape index: {}]   ;;  %s5019_s2 = inlined_call_operand.hbm [shape: f32[1,1024], index: 2, kind: input, shape index: {}]   ;;  %s5020_s3 = inlined_call_operand.hbm [shape: bf16[1024,512], index: 3, kind: input, shape index: {}]   ;;  %s5021_s4 = inlined_call_operand.hbm [shape: f32[1,512], index: 4, kind: input, shape index: {}]   ;;  %s5022_s5 = inlined_call_operand.hbm [shape: bf16[512,128], index: 5, kind: input, shape index: {}]   ;;  %s5023_s6 = inlined_call_operand.vmem [shape: f32[1,128], index: 6, kind: input, shape index: {}]   ;;  %s5024_s7 = inlined_call_operand.hbm [shape: bf16[128,128], index: 7, kind: input, shape index: {}]   ;;  %s5025_s8 = inlined_call_operand.vmem [shape: f32[1,128], index: 8, kind: input, shape index: {}]   ;;  %s5026_s9 = inlined_call_operand.hbm [shape: f32[16,128], index: 9, kind: output, shape index: {}]  }
   0x1   :  { %15 = vsyncpa [#allocation6], 0 }
   0x2   :  { %16 = vsyncpa [#allocation9], 0 }
   0x3   :  { %17 = vsyncpa [#allocation12], 0  ;;  %s36_s11 = sshll.u32 %s5018_s1, 4  ;;  %s37_s11 = int_to_ptr.hbm [resolvable:$true] %s36_s11 }
   0x4   :  { %18 = vsyncpa [#allocation4], 0  ;;  %s4800_s12 = smov [#allocation5]   ;;  %s60_s16 = sshll.u32 %s5020_s3, 4  ;;  %s61_s16 = int_to_ptr.hbm [resolvable:$true] %s60_s16 }
   0x5   :  { %s38_s13 = sshll.u32 %s4800_s12, 4  ;;  %s4801_s17 = smov 512   ;;  %s39_s13 = int_to_ptr.vmem [resolvable:$true] %s38_s13 }
   0x6   :  { %s4802_s18 = smov 32   ;;  %s4803_s19 = smov [#allocation8]  }
   0x7   :  { %44 = dma.hbm_to_vmem [thread:$0]  %s37_s11, 4096, %s39_s13, [#allocation6], %s4801_s17, %s4801_s17, %s4802_s18  }
   0x8   :  { %s62_s20 = sshll.u32 %s4803_s19, 4  ;;  %s4804_s21 = smov 256   ;;  %s63_s20 = int_to_ptr.vmem [resolvable:$true] %s62_s20 }
   0x9   :  { %s4805_s22 = smov 16   ;;  %s84_s24 = sshll.u32 %s5022_s5, 4  ;;  %s85_s24 = int_to_ptr.hbm [resolvable:$true] %s84_s24 }
   0xa   :  { %68 = dma.hbm_to_vmem [thread:$0]  %s61_s16, 32768, %s63_s20, [#allocation9], %s4804_s21, %s4804_s21, %s4805_s22  }
   0xb   :  { %s4806_s25 = smov [#allocation11]   ;;  %s23_s28 = sshll.u32 %s5017_s0, 4  ;;  %s24_s28 = int_to_ptr.hbm [resolvable:$true] %s23_s28 }
   0xc   :  { %s86_s26 = sshll.u32 %s4806_s25, 4  ;;  %s4807_s29 = smov 64   ;;  %s87_s26 = int_to_ptr.vmem [resolvable:$true] %s86_s26 }
   0xd   :  { %s4808_s30 = smov 4   ;;  %s4809_s10 = smov [#allocation2]  }
   0xe   :  { %92 = dma.hbm_to_vmem [thread:$0]  %s85_s24, 4096, %s87_s26, [#allocation12], %s4807_s29, %s4807_s29, %s4808_s30  }
   0xf   :  { %s25_s11 = sshll.u32 %s4809_s10, 4  ;;  %s50_s14 = sshll.u32 %s5019_s2, 4  ;;  %s26_s11 = int_to_ptr.vmem [resolvable:$true] %s25_s11  ;;  %s51_s14 = int_to_ptr.hbm [resolvable:$true] %s50_s14 }
  0x10   :  { %31 = dma.hbm_to_vmem [thread:$0]  %s24_s28, 128, %s26_s11, [#allocation3], %s4807_s29, %s4807_s29, %s4808_s30  }
  0x11   :  { %s74_s16 = sshll.u32 %s5021_s4, 4  ;;  %s4810_s17 = smov [#allocation7]   ;;  %s75_s16 = int_to_ptr.hbm [resolvable:$true] %s74_s16 }
  0x12   :  { %s52_s18 = sshll.u32 %s4810_s17, 4  ;;  %s4811_s0 = smov [#allocation10]   ;;  %s53_s18 = int_to_ptr.vmem [resolvable:$true] %s52_s18 }
  0x13   :  { %55 = dma.hbm_to_vmem [thread:$0]  %s51_s14, 128, %s53_s18, [#allocation6]  }
  0x14   :  { %s76_s19 = sshll.u32 %s4811_s0, 4  ;;  %s99_s22 = sshll.u32 %s5024_s7, 4  ;;  %s77_s19 = int_to_ptr.vmem [resolvable:$true] %s76_s19  ;;  %s100_s22 = int_to_ptr.hbm [resolvable:$true] %s99_s22 }
  0x15   :  { %79 = dma.hbm_to_vmem [thread:$0]  %s75_s16, 64, %s77_s19, [#allocation9]  }
  0x16   :  { %s4812_s2 = smov [#allocation13]  }
  0x17   :  { %s101_s1 = sshll.u32 %s4812_s2, 4  ;;  %s102_s1 = int_to_ptr.vmem [resolvable:$true] %s101_s1 }
  0x18   :  { %107 = dma.hbm_to_vmem [thread:$0]  %s100_s22, 1024, %s102_s1, [#allocation12], %s4807_s29, %s4807_s29, %s4808_s30  }
  0x19   :  { %4790 = dma.done.wait [#allocation3], 128  }
  0x1a   :  { %4791 = vsyncadd [#allocation3], 4294967168 }
  0x1b   :  { %4792 = dma.done.wait [#allocation6], 4224  }
  0x1c   :  { %4793 = vsyncadd [#allocation6], 4294963072 }
  0x1d   :  { %4794 = dma.done.wait [#allocation9], 32832  }
  0x1e   :  { %4795 = vsyncadd [#allocation9], 4294934464 }
  0x1f   :  { %4796 = dma.done.wait [#allocation12], 5120  }
  0x20   :  { %4797 = vsyncadd [#allocation12], 4294962176  ;;  %v3029_v0 = vld [vmem:[#allocation5 + $0xc0] sm:$0xf]  ;;  %v3037_v2 = vld [vmem:[#allocation5 + $0xc8] sm:$0xf] }
  0x21   :  { %v4280_v1 = vld [vmem:[#allocation5 + $0xdc] sm:$0xf0]  ;;  %v4281_v4 = vld [vmem:[#allocation5 + $0xe4] sm:$0xf0]  ;;  %v4277_v5 = vld [vmem:[#allocation5 + $0xcc] sm:$0xf] }
  0x22   :  { %v3030_v3 = vor.u32 %v4280_v1, %v3029_v0  ;;  %v3039_v6 = vld [vmem:[#allocation5 + $0xe8] sm:$0xf0]  ;;  %v3038_v7 = vor.u32 %v4281_v4, %v3037_v2  ;;  %v2997_v9 = vld [vmem:[#allocation5 + $0x80] sm:$0xf]  ;;  %v3005_v11 = vld [vmem:[#allocation5 + $0x88] sm:$0xf] }
  0x23   :  { %v3042_v8 = vor.u32 %v4277_v5, %v3039_v6  ;;  %v4272_v10 = vld [vmem:[#allocation5 + $0x9c] sm:$0xf0]  ;;  %v4273_v13 = vld [vmem:[#allocation5 + $0xa4] sm:$0xf0]  ;;  %v4269_v14 = vld [vmem:[#allocation5 + $0x8c] sm:$0xf] }
  0x24   :  { %364 = vmatpush.bf16.msra.mxu1 %v3030_v3  ;;  %v2998_v12 = vor.u32 %v4272_v10, %v2997_v9  ;;  %v3007_v15 = vld [vmem:[#allocation5 + $0xa8] sm:$0xf0]  ;;  %392 = vmatpush.bf16.msra.mxu2 %v3038_v7  ;;  %v3006_v16 = vor.u32 %v4273_v13, %v3005_v11  ;;  %v2965_v18 = vld [vmem:[#allocation5 + $0x40] sm:$0xf]  ;;  %v2973_v20 = vld [vmem:[#allocation5 + $0x48] sm:$0xf] }
  0x25   :  { %406 = vmatpush.bf16.msra.mxu3 %v3042_v8  ;;  %v3010_v17 = vor.u32 %v4269_v14, %v3007_v15  ;;  %v4264_v19 = vld [vmem:[#allocation5 + $0x5c] sm:$0xf0]  ;;  %v4265_v21 = vld [vmem:[#allocation5 + $0x64] sm:$0xf0]  ;;  %v4261_v22 = vld [vmem:[#allocation5 + $0x4c] sm:$0xf] }
  0x26   :  { %v2975_v23 = vld [vmem:[#allocation5 + $0x68] sm:$0xf0]  ;;  %v2966_v24 = vor.u32 %v4264_v19, %v2965_v18  ;;  %v2933_v25 = vld [vmem:[#allocation5] sm:$0xf]  ;;  %v2941_v27 = vld [vmem:[#allocation5 + $0x8] sm:$0xf]  ;;  %v2974_v28 = vor.u32 %v4265_v21, %v2973_v20 }
  0x27   :  { %v4256_v26 = vld [vmem:[#allocation5 + $0x1c] sm:$0xf0]  ;;  %v2978_v29 = vor.u32 %v4261_v22, %v2975_v23  ;;  %v4257_v30 = vld [vmem:[#allocation5 + $0x24] sm:$0xf0]  ;;  %v4253_v31 = vld [vmem:[#allocation5 + $0xc] sm:$0xf] }
  0x28   :  { %365 = vmatpush.bf16.msra.mxu1 %v2998_v12  ;;  %393 = vmatpush.bf16.msra.mxu2 %v3006_v16  ;;  %v2943_v32 = vld [vmem:[#allocation5 + $0x28] sm:$0xf0]  ;;  %v4276_v33 = vld [vmem:[#allocation5 + $0xc4] sm:$0xf]  ;;  %v3045_v34 = vld [vmem:[#allocation5 + $0xd0] sm:$0xf]  ;;  %v2934_v40 = vor.u32 %v4256_v26, %v2933_v25  ;;  %v2942_v43 = vor.u32 %v4257_v30, %v2941_v27 }
  0x29   :  { %407 = vmatpush.bf16.msra.mxu3 %v3010_v17  ;;  %v4282_v35 = vld [vmem:[#allocation5 + $0xec] sm:$0xf0]  ;;  %v3031_v36 = vld [vmem:[#allocation5 + $0xe0] sm:$0xf0]  ;;  %v3053_v38 = vld [vmem:[#allocation5 + $0xd8] sm:$0xf]  ;;  %v2946_v44 = vor.u32 %v4253_v31, %v2943_v32 }
  0x2a   :  { %v3046_v37 = vor.u32 %v4282_v35, %v3045_v34  ;;  %v4283_v39 = vld [vmem:[#allocation5 + $0xf4] sm:$0xf0]  ;;  %v4279_v41 = vld [vmem:[#allocation5 + $0xdc] sm:$0xf]  ;;  %v3034_v46 = vor.u32 %v4276_v33, %v3031_v36  ;;  %v4268_v48 = vld [vmem:[#allocation5 + $0x84] sm:$0xf] }
  0x2b   :  { %v3055_v42 = vld [vmem:[#allocation5 + $0xf8] sm:$0xf0]  ;;  %v3054_v47 = vor.u32 %v4283_v39, %v3053_v38  ;;  %v3013_v49 = vld [vmem:[#allocation5 + $0x90] sm:$0xf]  ;;  %v2999_v52 = vld [vmem:[#allocation5 + $0xa0] sm:$0xf0] }
  0x2c   :  { %366 = vmatpush.bf16.msra.mxu1 %v2966_v24  ;;  %394 = vmatpush.bf16.msra.mxu2 %v2974_v28  ;;  %v4887_v45 = vld [vmem:[#allocation2] sm:$0xff]  ;;  %v4274_v50 = vld [vmem:[#allocation5 + $0xac] sm:$0xf0]  ;;  %v3058_v51 = vor.u32 %v4279_v41, %v3055_v42  ;;  %vm356_vm0 = vcmask 523264   ;;  %v3002_v58 = vor.u32 %v4268_v48, %v2999_v52  ;;  %v4260_v60 = vld [vmem:[#allocation5 + $0x44] sm:$0xf] }
  0x2d   :  { %408 = vmatpush.bf16.msra.mxu3 %v2978_v29  ;;  %420 = vmatpush.bf16.msra.mxu0 %v3046_v37  ;;  %v3021_v53 = vld [vmem:[#allocation5 + $0x98] sm:$0xf]  ;;  %v4271_v55 = vld [vmem:[#allocation5 + $0x9c] sm:$0xf]  ;;  %v3014_v57 = vor.u32 %v4274_v50, %v3013_v49  ;;  %v2981_v61 = vld [vmem:[#allocation5 + $0x50] sm:$0xf] }
  0x2e   :  { %v4275_v54 = vld [vmem:[#allocation5 + $0xb4] sm:$0xf0]  ;;  %v3023_v56 = vld [vmem:[#allocation5 + $0xb8] sm:$0xf0]  ;;  %v4266_v62 = vld [vmem:[#allocation5 + $0x6c] sm:$0xf0] }
  0x2f   :  { %v3022_v59 = vor.u32 %v4275_v54, %v3021_v53  ;;  %v3026_v63 = vor.u32 %v4271_v55, %v3023_v56  ;;  %v2967_v0 = vld [vmem:[#allocation5 + $0x60] sm:$0xf0]  ;;  %v2989_v1 = vld [vmem:[#allocation5 + $0x58] sm:$0xf]  ;;  %v4263_v3 = vld [vmem:[#allocation5 + $0x5c] sm:$0xf]  ;;  %v2982_v5 = vor.u32 %v4266_v62, %v2981_v61 }
  0x30   :  { %367 = vmatpush.bf16.msra.mxu1 %v2934_v40  ;;  %395 = vmatpush.bf16.msra.mxu2 %v2942_v43  ;;  %v4267_v2 = vld [vmem:[#allocation5 + $0x74] sm:$0xf0]  ;;  %v2991_v4 = vld [vmem:[#allocation5 + $0x78] sm:$0xf0]  ;;  %v4252_v6 = vld [vmem:[#allocation5 + $0x4] sm:$0xf]  ;;  %v2970_v7 = vor.u32 %v4260_v60, %v2967_v0 }
  0x31   :  { %409 = vmatpush.bf16.msra.mxu3 %v2946_v44  ;;  %421 = vmatpush.bf16.msra.mxu0 %v3014_v57  ;;  %v2990_v8 = vor.u32 %v4267_v2, %v2989_v1  ;;  %v2935_v9 = vld [vmem:[#allocation5 + $0x20] sm:$0xf0]  ;;  %v2949_v10 = vld [vmem:[#allocation5 + $0x10] sm:$0xf]  ;;  %v2994_v12 = vor.u32 %v4263_v3, %v2991_v4  ;;  %v2957_v13 = vld [vmem:[#allocation5 + $0x18] sm:$0xf] }
  0x32   :  { %v4258_v11 = vld [vmem:[#allocation5 + $0x2c] sm:$0xf0]  ;;  %v4259_v14 = vld [vmem:[#allocation5 + $0x34] sm:$0xf0]  ;;  %v4255_v15 = vld [vmem:[#allocation5 + $0x1c] sm:$0xf]  ;;  %v2938_v23 = vor.u32 %v4252_v6, %v2935_v9 }
  0x33   :  { %3059 = vmatmul.msk.bf16.vlgmr.msra.gmra.mxu1 %vm356_vm0, %v4887_v45  ;;  %3061 = vmatmul.msk.bf16.vlgmr.msra.gmra.mxu2 %vm356_vm0, %v4887_v45  ;;  %v2959_v16 = vld [vmem:[#allocation5 + $0x38] sm:$0xf0]  ;;  %v4278_v17 = vld [vmem:[#allocation5 + $0xd4] sm:$0xf]  ;;  %v2950_v19 = vor.u32 %v4258_v11, %v2949_v10  ;;  %v3181_v20 = vld [vmem:[#allocation8 + $0xe0] sm:$0xf]  ;;  %v2958_v24 = vor.u32 %v4259_v14, %v2957_v13 }
  0x34   :  { %378 = vmatpush.bf16.msrb.mxu1 %v3034_v46  ;;  %448 = vmatpush.bf16.msrb.mxu2 %v3054_v47  ;;  %v3047_v18 = vld [vmem:[#allocation5 + $0xf0] sm:$0xf0]  ;;  %v3437_v21 = vld [vmem:[#allocation8 + $0x2e0] sm:$0xf]  ;;  %v4378_v22 = vld [vmem:[#allocation8 + $0x2ec] sm:$0xf0]  ;;  %v2962_v28 = vor.u32 %v4255_v15, %v2959_v16 }
  0x35   :  { %462 = vmatpush.bf16.msrb.mxu3 %v3058_v51  ;;  %422 = vmatpush.bf16.msra.mxu0 %v2982_v5  ;;  %v4314_v25 = vld [vmem:[#allocation8 + $0xec] sm:$0xf0]  ;;  %v3565_v26 = vld [vmem:[#allocation8 + $0x3e0] sm:$0xf]  ;;  %v3050_v29 = vor.u32 %v4278_v17, %v3047_v18  ;;  %v3438_v30 = vor.u32 %v4378_v22, %v3437_v21  ;;  %v4270_v31 = vld [vmem:[#allocation5 + $0x94] sm:$0xf] }
  0x36   :  { %3062 = vmatmul.msk.bf16.vlgmr.msra.gmra.mxu3 %vm356_vm0, %v4887_v45  ;;  %v4410_v27 = vld [vmem:[#allocation8 + $0x3ec] sm:$0xf0]  ;;  %v3015_v32 = vld [vmem:[#allocation5 + $0xb0] sm:$0xf0]  ;;  %v3182_v33 = vor.u32 %v4314_v25, %v3181_v20  ;;  %v3165_v35 = vld [vmem:[#allocation8 + $0xc0] sm:$0xf] }
  0x37   :  { %v3566_v34 = vor.u32 %v4410_v27, %v3565_v26  ;;  %v4310_v36 = vld [vmem:[#allocation8 + $0xcc] sm:$0xf0]  ;;  %v3421_v37 = vld [vmem:[#allocation8 + $0x2c0] sm:$0xf]  ;;  %v3018_v41 = vor.u32 %v4270_v31, %v3015_v32  ;;  %v4262_v42 = vld [vmem:[#allocation5 + $0x54] sm:$0xf] }
  0x38   :  { %379 = vmatpush.bf16.msrb.mxu1 %v3002_v58  ;;  %449 = vmatpush.bf16.msrb.mxu2 %v3022_v59  ;;  %v4374_v38 = vld [vmem:[#allocation8 + $0x2cc] sm:$0xf0]  ;;  %v3549_v39 = vld [vmem:[#allocation8 + $0x3c0] sm:$0xf]  ;;  %v2983_v43 = vld [vmem:[#allocation5 + $0x70] sm:$0xf0]  ;;  %v3166_v44 = vor.u32 %v4310_v36, %v3165_v35 }
  0x39   :  { %463 = vmatpush.bf16.msrb.mxu3 %v3026_v63  ;;  %423 = vmatpush.bf16.msra.mxu0 %v2950_v19  ;;  %v4406_v40 = vld [vmem:[#allocation8 + $0x3cc] sm:$0xf0]  ;;  %v3149_v46 = vld [vmem:[#allocation8 + $0xa0] sm:$0xf]  ;;  %v3422_v48 = vor.u32 %v4374_v38, %v3421_v37  ;;  %v2986_v54 = vor.u32 %v4262_v42, %v2983_v43  ;;  %v4254_v55 = vld [vmem:[#allocation5 + $0x14] sm:$0xf] }
  0x3a   :  { %v4306_v47 = vld [vmem:[#allocation8 + $0xac] sm:$0xf0]  ;;  %v3550_v49 = vor.u32 %v4406_v40, %v3549_v39  ;;  %v3405_v50 = vld [vmem:[#allocation8 + $0x2a0] sm:$0xf]  ;;  %v2951_v56 = vld [vmem:[#allocation5 + $0x30] sm:$0xf0] }
  0x3b   :  { %v4370_v51 = vld [vmem:[#allocation8 + $0x2ac] sm:$0xf0]  ;;  %v3533_v52 = vld [vmem:[#allocation8 + $0x3a0] sm:$0xf]  ;;  %v3150_v57 = vor.u32 %v4306_v47, %v3149_v46  ;;  %v2954_v4 = vor.u32 %v4254_v55, %v2951_v56  ;;  %s2911_s3 = sshll.u32 %s5026_s9, 4  ;;  %s4814_s28 = smov 128   ;;  %s2912_s3 = int_to_ptr.hbm [resolvable:$true] %s2911_s3 }
  0x3c   :  { %380 = vmatpush.bf16.msrb.mxu1 %v2970_v7  ;;  %450 = vmatpush.bf16.msrb.mxu2 %v2990_v8  ;;  %v4402_v53 = vld [vmem:[#allocation8 + $0x3ac] sm:$0xf0]  ;;  %v3133_v58 = vld [vmem:[#allocation8 + $0x80] sm:$0xf]  ;;  %v3406_v60 = vor.u32 %v4370_v51, %v3405_v50  ;;  %s4815_s29 = smov 8  }
  0x3d   :  { %464 = vmatpush.bf16.msrb.mxu3 %v2994_v12  ;;  %3063 = vmatmul.msk.bf16.vlgmr.msra.gmra.mxu0 %vm356_vm0, %v4887_v45  ;;  %v4302_v59 = vld [vmem:[#allocation8 + $0x8c] sm:$0xf0]  ;;  %v3534_v61 = vor.u32 %v4402_v53, %v3533_v52  ;;  %v3309_v62 = vld [vmem:[#allocation8 + $0x1e0] sm:$0xf] }
  0x3e   :  { %2042 = vmatpush.bf16.msrb.mxu0 %v3182_v33  ;;  %v4346_v63 = vld [vmem:[#allocation8 + $0x1ec] sm:$0xf0]  ;;  %v3389_v0 = vld [vmem:[#allocation8 + $0x280] sm:$0xf]  ;;  %v3134_v5 = vor.u32 %v4302_v59, %v3133_v58 }
  0x3f   :  { %v4366_v1 = vld [vmem:[#allocation8 + $0x28c] sm:$0xf0]  ;;  %v3517_v2 = vld [vmem:[#allocation8 + $0x380] sm:$0xf]  ;;  %v3310_v8 = vor.u32 %v4346_v63, %v3309_v62 }
  0x40   :  { %381 = vmatpush.bf16.msrb.mxu1 %v2938_v23  ;;  %451 = vmatpush.bf16.msrb.mxu2 %v2958_v24  ;;  %v4398_v3 = vld [vmem:[#allocation8 + $0x38c] sm:$0xf0]  ;;  %v3117_v6 = vld [vmem:[#allocation8 + $0x60] sm:$0xf]  ;;  %v3390_v9 = vor.u32 %v4366_v1, %v3389_v0 }
  0x41   :  { %465 = vmatpush.bf16.msrb.mxu3 %v2962_v28  ;;  %v4298_v7 = vld [vmem:[#allocation8 + $0x6c] sm:$0xf0]  ;;  %v3293_v10 = vld [vmem:[#allocation8 + $0x1c0] sm:$0xf]  ;;  %v3518_v11 = vor.u32 %v4398_v3, %v3517_v2 }
  0x42   :  { %2043 = vmatpush.bf16.msrb.mxu0 %v3166_v44  ;;  %v4342_v12 = vld [vmem:[#allocation8 + $0x1cc] sm:$0xf0]  ;;  %v3373_v13 = vld [vmem:[#allocation8 + $0x260] sm:$0xf]  ;;  %v3118_v17 = vor.u32 %v4298_v7, %v3117_v6 }
  0x43   :  { %3060 = vmatmul.msk.bf16.vlgmr.msrb.gmra.mxu1 %vm356_vm0, %v4887_v45  ;;  %3065 = vmatmul.msk.bf16.vlgmr.msrb.gmra.mxu2 %vm356_vm0, %v4887_v45  ;;  %v4362_v14 = vld [vmem:[#allocation8 + $0x26c] sm:$0xf0]  ;;  %v3501_v15 = vld [vmem:[#allocation8 + $0x360] sm:$0xf]  ;;  %v3294_v20 = vor.u32 %v4342_v12, %v3293_v10 }
  0x44   :  { %434 = vmatpush.bf16.msra.mxu1 %v3050_v29  ;;  %2070 = vmatpush.bf16.msra.mxu2 %v3438_v30  ;;  %v4394_v16 = vld [vmem:[#allocation8 + $0x36c] sm:$0xf0]  ;;  %v3101_v18 = vld [vmem:[#allocation8 + $0x40] sm:$0xf]  ;;  %v3374_v21 = vor.u32 %v4362_v14, %v3373_v13 }
  0x45   :  { %2084 = vmatpush.bf16.msra.mxu3 %v3566_v34  ;;  %v4294_v19 = vld [vmem:[#allocation8 + $0x4c] sm:$0xf0]  ;;  %v3277_v22 = vld [vmem:[#allocation8 + $0x1a0] sm:$0xf]  ;;  %v3502_v23 = vor.u32 %v4394_v16, %v3501_v15 }
  0x46   :  { %3066 = vmatmul.msk.bf16.vlgmr.msrb.gmra.mxu3 %vm356_vm0, %v4887_v45  ;;  %2044 = vmatpush.bf16.msrb.mxu0 %v3150_v57  ;;  %v4338_v24 = vld [vmem:[#allocation8 + $0x1ac] sm:$0xf0]  ;;  %v3357_v25 = vld [vmem:[#allocation8 + $0x240] sm:$0xf]  ;;  %v3102_v29 = vor.u32 %v4294_v19, %v3101_v18 }
  0x47   :  { %v4358_v26 = vld [vmem:[#allocation8 + $0x24c] sm:$0xf0]  ;;  %v3485_v27 = vld [vmem:[#allocation8 + $0x340] sm:$0xf]  ;;  %v3278_v32 = vor.u32 %v4338_v24, %v3277_v22 }
  0x48   :  { %435 = vmatpush.bf16.msra.mxu1 %v3018_v41  ;;  %2071 = vmatpush.bf16.msra.mxu2 %v3422_v48  ;;  %v4390_v28 = vld [vmem:[#allocation8 + $0x34c] sm:$0xf0]  ;;  %v3085_v30 = vld [vmem:[#allocation8 + $0x20] sm:$0xf]  ;;  %v3358_v33 = vor.u32 %v4358_v26, %v3357_v25 }
  0x49   :  { %2085 = vmatpush.bf16.msra.mxu3 %v3550_v49  ;;  %v4290_v31 = vld [vmem:[#allocation8 + $0x2c] sm:$0xf0]  ;;  %v3261_v34 = vld [vmem:[#allocation8 + $0x180] sm:$0xf]  ;;  %v3486_v35 = vor.u32 %v4390_v28, %v3485_v27 }
  0x4a   :  { %2045 = vmatpush.bf16.msrb.mxu0 %v3134_v5  ;;  %v4334_v36 = vld [vmem:[#allocation8 + $0x18c] sm:$0xf0]  ;;  %v3341_v37 = vld [vmem:[#allocation8 + $0x220] sm:$0xf]  ;;  %v3086_v41 = vor.u32 %v4290_v31, %v3085_v30 }
  0x4b   :  { %v4354_v38 = vld [vmem:[#allocation8 + $0x22c] sm:$0xf0]  ;;  %v3469_v39 = vld [vmem:[#allocation8 + $0x320] sm:$0xf]  ;;  %v3262_v44 = vor.u32 %v4334_v36, %v3261_v34 }
  0x4c   :  { %436 = vmatpush.bf16.msra.mxu1 %v2986_v54  ;;  %2072 = vmatpush.bf16.msra.mxu2 %v3406_v60  ;;  %v4386_v40 = vld [vmem:[#allocation8 + $0x32c] sm:$0xf0]  ;;  %v3069_v42 = vld [vmem:[#allocation8] sm:$0xf]  ;;  %v3342_v48 = vor.u32 %v4354_v38, %v3341_v37 }
  0x4d   :  { %2086 = vmatpush.bf16.msra.mxu3 %v3534_v61  ;;  %v4286_v43 = vld [vmem:[#allocation8 + $0xc] sm:$0xf0]  ;;  %v3693_v46 = vld [vmem:[#allocation8 + $0x4e0] sm:$0xf] }
  0x4e   :  { %2046 = vmatpush.bf16.msrb.mxu0 %v3118_v17  ;;  %v4442_v47 = vld [vmem:[#allocation8 + $0x4ec] sm:$0xf0]  ;;  %v3245_v49 = vld [vmem:[#allocation8 + $0x160] sm:$0xf]  ;;  %v3070_v56 = vor.u32 %v4286_v43, %v3069_v42 }
  0x4f   :  { %v4330_v50 = vld [vmem:[#allocation8 + $0x16c] sm:$0xf0]  ;;  %v3325_v51 = vld [vmem:[#allocation8 + $0x200] sm:$0xf]  ;;  %v3694_v60 = vor.u32 %v4442_v47, %v3693_v46 }
  0x50   :  { %437 = vmatpush.bf16.msra.mxu1 %v2954_v4  ;;  %2073 = vmatpush.bf16.msra.mxu2 %v3390_v9  ;;  %v4350_v52 = vld [vmem:[#allocation8 + $0x20c] sm:$0xf0]  ;;  %v3453_v53 = vld [vmem:[#allocation8 + $0x300] sm:$0xf]  ;;  %v3246_v61 = vor.u32 %v4330_v50, %v3245_v49 }
  0x51   :  { %2087 = vmatpush.bf16.msra.mxu3 %v3518_v11  ;;  %v4382_v54 = vld [vmem:[#allocation8 + $0x30c] sm:$0xf0]  ;;  %v3949_v55 = vld [vmem:[#allocation8 + $0x6e0] sm:$0xf]  ;;  %v3326_v0 = vor.u32 %v4350_v52, %v3325_v51 }
  0x52   :  { %2047 = vmatpush.bf16.msrb.mxu0 %v3102_v29  ;;  %v4506_v57 = vld [vmem:[#allocation8 + $0x6ec] sm:$0xf0]  ;;  %v4077_v58 = vld [vmem:[#allocation8 + $0x7e0] sm:$0xf]  ;;  %v3454_v1 = vor.u32 %v4382_v54, %v3453_v53 }
  0x53   :  { %3064 = vmatmul.msk.bf16.vlgmr.msra.gmra.mxu1 %vm356_vm0, %v4887_v45  ;;  %v3470_v45 = vor.u32 %v4386_v40, %v3469_v39  ;;  %v4538_v59 = vld [vmem:[#allocation8 + $0x7ec] sm:$0xf0]  ;;  %v3677_v62 = vld [vmem:[#allocation8 + $0x4c0] sm:$0xf]  ;;  %v3950_v4 = vor.u32 %v4506_v57, %v3949_v55 }
  0x54   :  { %2056 = vmatpush.bf16.msrb.mxu1 %v3310_v8  ;;  %2074 = vmatpush.bf16.msra.mxu2 %v3374_v21  ;;  %v4438_v63 = vld [vmem:[#allocation8 + $0x4cc] sm:$0xf0]  ;;  %v3229_v2 = vld [vmem:[#allocation8 + $0x140] sm:$0xf]  ;;  %v4078_v5 = vor.u32 %v4538_v59, %v4077_v58 }
  0x55   :  { %2088 = vmatpush.bf16.msra.mxu3 %v3502_v23  ;;  %v4326_v3 = vld [vmem:[#allocation8 + $0x14c] sm:$0xf0]  ;;  %v3933_v6 = vld [vmem:[#allocation8 + $0x6c0] sm:$0xf]  ;;  %v3678_v10 = vor.u32 %v4438_v63, %v3677_v62 }
  0x56   :  { %2048 = vmatpush.bf16.msrb.mxu0 %v3086_v41  ;;  %v4502_v7 = vld [vmem:[#allocation8 + $0x6cc] sm:$0xf0]  ;;  %v4061_v8 = vld [vmem:[#allocation8 + $0x7c0] sm:$0xf]  ;;  %v3230_v11 = vor.u32 %v4326_v3, %v3229_v2 }
  0x57   :  { %v4534_v9 = vld [vmem:[#allocation8 + $0x7cc] sm:$0xf0]  ;;  %v3661_v12 = vld [vmem:[#allocation8 + $0x4a0] sm:$0xf]  ;;  %v3934_v16 = vor.u32 %v4502_v7, %v3933_v6 }
  0x58   :  { %2057 = vmatpush.bf16.msrb.mxu1 %v3294_v20  ;;  %2075 = vmatpush.bf16.msra.mxu2 %v3358_v33  ;;  %v4434_v13 = vld [vmem:[#allocation8 + $0x4ac] sm:$0xf0]  ;;  %v3213_v14 = vld [vmem:[#allocation8 + $0x120] sm:$0xf]  ;;  %v4062_v17 = vor.u32 %v4534_v9, %v4061_v8 }
  0x59   :  { %2089 = vmatpush.bf16.msra.mxu3 %v3486_v35  ;;  %v4322_v15 = vld [vmem:[#allocation8 + $0x12c] sm:$0xf0]  ;;  %v3662_v18 = vor.u32 %v4434_v13, %v3661_v12  ;;  %v3645_v20 = vld [vmem:[#allocation8 + $0x480] sm:$0xf] }
  0x5a   :  { %2049 = vmatpush.bf16.msrb.mxu0 %v3070_v56  ;;  %v3214_v19 = vor.u32 %v4322_v15, %v3213_v14  ;;  %v4430_v21 = vld [vmem:[#allocation8 + $0x48c] sm:$0xf0]  ;;  %v3917_v23 = vld [vmem:[#allocation8 + $0x6a0] sm:$0xf] }
  0x5b   :  { %v3646_v22 = vor.u32 %v4430_v21, %v3645_v20  ;;  %v4498_v24 = vld [vmem:[#allocation8 + $0x6ac] sm:$0xf0]  ;;  %v4045_v25 = vld [vmem:[#allocation8 + $0x7a0] sm:$0xf] }
  0x5c   :  { %2058 = vmatpush.bf16.msrb.mxu1 %v3278_v32  ;;  %2076 = vmatpush.bf16.msra.mxu2 %v3342_v48  ;;  %v3918_v26 = vor.u32 %v4498_v24, %v3917_v23  ;;  %v4530_v27 = vld [vmem:[#allocation8 + $0x7ac] sm:$0xf0]  ;;  %v3197_v28 = vld [vmem:[#allocation8 + $0x100] sm:$0xf] }
  0x5d   :  { %2090 = vmatpush.bf16.msra.mxu3 %v3470_v45  ;;  %v4318_v29 = vld [vmem:[#allocation8 + $0x10c] sm:$0xf0]  ;;  %v4046_v30 = vor.u32 %v4530_v27, %v4045_v25  ;;  %v3629_v32 = vld [vmem:[#allocation8 + $0x460] sm:$0xf] }
  0x5e   :  { %2098 = vmatpush.bf16.msra.mxu0 %v3694_v60  ;;  %v3198_v31 = vor.u32 %v4318_v29, %v3197_v28  ;;  %v4426_v33 = vld [vmem:[#allocation8 + $0x46c] sm:$0xf0]  ;;  %v3821_v34 = vld [vmem:[#allocation8 + $0x5e0] sm:$0xf] }
  0x5f   :  { %v3630_v35 = vor.u32 %v4426_v33, %v3629_v32  ;;  %v4474_v36 = vld [vmem:[#allocation8 + $0x5ec] sm:$0xf0]  ;;  %v3901_v38 = vld [vmem:[#allocation8 + $0x680] sm:$0xf] }
  0x60   :  { %2059 = vmatpush.bf16.msrb.mxu1 %v3262_v44  ;;  %2077 = vmatpush.bf16.msra.mxu2 %v3326_v0  ;;  %v3822_v37 = vor.u32 %v4474_v36, %v3821_v34  ;;  %v4494_v39 = vld [vmem:[#allocation8 + $0x68c] sm:$0xf0]  ;;  %v4029_v40 = vld [vmem:[#allocation8 + $0x780] sm:$0xf]  ;;  %v4905_v34 = vld [vmem:[#allocation7] sm:$0xff] }
  0x61   :  { %2091 = vmatpush.bf16.msra.mxu3 %v3454_v1  ;;  %v3902_v41 = vor.u32 %v4494_v39, %v3901_v38  ;;  %v4526_v42 = vld [vmem:[#allocation8 + $0x78c] sm:$0xf0]  ;;  %v3613_v44 = vld [vmem:[#allocation8 + $0x440] sm:$0xf]  ;;  %v175_v36 = vperm.slane %v4905_v34, 0 }
  0x62   :  { %2099 = vmatpush.bf16.msra.mxu0 %v3678_v10  ;;  %v4030_v43 = vor.u32 %v4526_v42, %v4029_v40  ;;  %v4422_v46 = vld [vmem:[#allocation8 + $0x44c] sm:$0xf0]  ;;  %v3805_v47 = vld [vmem:[#allocation8 + $0x5c0] sm:$0xf]  ;;  %v178_v40 = vperm.slane %v4905_v34, 3 }
  0x63   :  { %v3614_v48 = vor.u32 %v4422_v46, %v3613_v44  ;;  %v4470_v49 = vld [vmem:[#allocation8 + $0x5cc] sm:$0xf0]  ;;  %v3885_v50 = vld [vmem:[#allocation8 + $0x660] sm:$0xf]  ;;  %v3183_v44 = vld [vmem:[#allocation8 + $0xf0] sm:$0xf0] }
  0x64   :  { %2060 = vmatpush.bf16.msrb.mxu1 %v3246_v61  ;;  %2126 = vmatpush.bf16.msrb.mxu2 %v3950_v4  ;;  %v3806_v45 = vor.u32 %v4470_v49, %v3805_v47  ;;  %v4490_v51 = vld [vmem:[#allocation8 + $0x66c] sm:$0xf0]  ;;  %v4013_v52 = vld [vmem:[#allocation8 + $0x760] sm:$0xf]  ;;  %v177_v46 = vperm.slane %v4905_v34, 2 }
  0x65   :  { %2140 = vmatpush.bf16.msrb.mxu3 %v4078_v5  ;;  %v3886_v53 = vor.u32 %v4490_v51, %v3885_v50  ;;  %v4522_v54 = vld [vmem:[#allocation8 + $0x76c] sm:$0xf0]  ;;  %v3597_v56 = vld [vmem:[#allocation8 + $0x420] sm:$0xf]  ;;  %v4308_v50 = vld [vmem:[#allocation8 + $0xc4] sm:$0xf] }
  0x66   :  { %2100 = vmatpush.bf16.msra.mxu0 %v3662_v18  ;;  %v4014_v55 = vor.u32 %v4522_v54, %v4013_v52  ;;  %v4418_v57 = vld [vmem:[#allocation8 + $0x42c] sm:$0xf0]  ;;  %v3789_v58 = vld [vmem:[#allocation8 + $0x5a0] sm:$0xf]  ;;  %v3167_v51 = vld [vmem:[#allocation8 + $0xd0] sm:$0xf0] }
  0x67   :  { %v3598_v59 = vor.u32 %v4418_v57, %v3597_v56  ;;  %v4466_v60 = vld [vmem:[#allocation8 + $0x5ac] sm:$0xf0]  ;;  %v3869_v62 = vld [vmem:[#allocation8 + $0x640] sm:$0xf]  ;;  %v3170_v57 = vor.u32 %v4308_v50, %v3167_v51 }
  0x68   :  { %2061 = vmatpush.bf16.msrb.mxu1 %v3230_v11  ;;  %2127 = vmatpush.bf16.msrb.mxu2 %v3934_v16  ;;  %v3790_v61 = vor.u32 %v4466_v60, %v3789_v58  ;;  %v4486_v63 = vld [vmem:[#allocation8 + $0x64c] sm:$0xf0]  ;;  %v3997_v1 = vld [vmem:[#allocation8 + $0x740] sm:$0xf]  ;;  %v4376_v58 = vld [vmem:[#allocation8 + $0x2e4] sm:$0xf] }
  0x69   :  { %2141 = vmatpush.bf16.msrb.mxu3 %v4062_v17  ;;  %v3870_v0 = vor.u32 %v4486_v63, %v3869_v62  ;;  %v4518_v2 = vld [vmem:[#allocation8 + $0x74c] sm:$0xf0]  ;;  %v3581_v4 = vld [vmem:[#allocation8 + $0x400] sm:$0xf] }
  0x6a   :  { %2101 = vmatpush.bf16.msra.mxu0 %v3646_v22  ;;  %v3998_v3 = vor.u32 %v4518_v2, %v3997_v1  ;;  %v4414_v5 = vld [vmem:[#allocation8 + $0x40c] sm:$0xf0]  ;;  %v3773_v6 = vld [vmem:[#allocation8 + $0x580] sm:$0xf]  ;;  %v4408_v1 = vld [vmem:[#allocation8 + $0x3e4] sm:$0xf] }
  0x6b   :  { %v3582_v7 = vor.u32 %v4414_v5, %v3581_v4  ;;  %v4462_v8 = vld [vmem:[#allocation8 + $0x58c] sm:$0xf0]  ;;  %v3853_v10 = vld [vmem:[#allocation8 + $0x620] sm:$0xf]  ;;  %v3567_v2 = vld [vmem:[#allocation8 + $0x3f0] sm:$0xf0] }
  0x6c   :  { %2062 = vmatpush.bf16.msrb.mxu1 %v3214_v19  ;;  %2128 = vmatpush.bf16.msrb.mxu2 %v3918_v26  ;;  %v3774_v9 = vor.u32 %v4462_v8, %v3773_v6  ;;  %v4482_v11 = vld [vmem:[#allocation8 + $0x62c] sm:$0xf0]  ;;  %v3981_v12 = vld [vmem:[#allocation8 + $0x720] sm:$0xf]  ;;  %v3151_v4 = vld [vmem:[#allocation8 + $0xb0] sm:$0xf0] }
  0x6d   :  { %2142 = vmatpush.bf16.msrb.mxu3 %v4046_v30  ;;  %v3854_v13 = vor.u32 %v4482_v11, %v3853_v10  ;;  %v4514_v14 = vld [vmem:[#allocation8 + $0x72c] sm:$0xf0]  ;;  %v3757_v16 = vld [vmem:[#allocation8 + $0x560] sm:$0xf]  ;;  %v176_v8 = vperm.slane %v4905_v34, 1  ;;  %v3570_v10 = vor.u32 %v4408_v1, %v3567_v2 }
  0x6e   :  { %2102 = vmatpush.bf16.msra.mxu0 %v3630_v35  ;;  %v3982_v15 = vor.u32 %v4514_v14, %v3981_v12  ;;  %v4458_v17 = vld [vmem:[#allocation8 + $0x56c] sm:$0xf0]  ;;  %v3837_v19 = vld [vmem:[#allocation8 + $0x600] sm:$0xf]  ;;  %v4372_v11 = vld [vmem:[#allocation8 + $0x2c4] sm:$0xf] }
  0x6f   :  { %v3758_v18 = vor.u32 %v4458_v17, %v3757_v16  ;;  %v4478_v20 = vld [vmem:[#allocation8 + $0x60c] sm:$0xf0]  ;;  %v3965_v21 = vld [vmem:[#allocation8 + $0x700] sm:$0xf]  ;;  %v3423_v16 = vld [vmem:[#allocation8 + $0x2d0] sm:$0xf0] }
  0x70   :  { %2063 = vmatpush.bf16.msrb.mxu1 %v3198_v31  ;;  %2129 = vmatpush.bf16.msrb.mxu2 %v3902_v41  ;;  %v3838_v22 = vor.u32 %v4478_v20, %v3837_v19  ;;  %v4510_v23 = vld [vmem:[#allocation8 + $0x70c] sm:$0xf0]  ;;  %v3741_v25 = vld [vmem:[#allocation8 + $0x540] sm:$0xf]  ;;  %v4404_v17 = vld [vmem:[#allocation8 + $0x3c4] sm:$0xf] }
  0x71   :  { %2143 = vmatpush.bf16.msrb.mxu3 %v4030_v43  ;;  %v3966_v24 = vor.u32 %v4510_v23, %v3965_v21  ;;  %v4454_v26 = vld [vmem:[#allocation8 + $0x54c] sm:$0xf0]  ;;  %v3725_v28 = vld [vmem:[#allocation8 + $0x520] sm:$0xf]  ;;  %v4312_v43 = vld [vmem:[#allocation8 + $0xe4] sm:$0xf] }
  0x72   :  { %2103 = vmatpush.bf16.msra.mxu0 %v3614_v48  ;;  %v3742_v27 = vor.u32 %v4454_v26, %v3741_v25  ;;  %v4450_v29 = vld [vmem:[#allocation8 + $0x52c] sm:$0xf0]  ;;  %v3709_v31 = vld [vmem:[#allocation8 + $0x500] sm:$0xf]  ;;  %v4300_v20 = vld [vmem:[#allocation8 + $0x84] sm:$0xf] }
  0x73   :  { %v3726_v30 = vor.u32 %v4450_v29, %v3725_v28  ;;  %v4446_v32 = vld [vmem:[#allocation8 + $0x50c] sm:$0xf0]  ;;  %v3135_v21 = vld [vmem:[#allocation8 + $0x90] sm:$0xf0]  ;;  %v182_v26 = vperm.slane %v4905_v34, 7  ;;  %v3426_v28 = vor.u32 %v4372_v11, %v3423_v16 }
  0x74   :  { %2112 = vmatpush.bf16.msra.mxu1 %v3822_v37  ;;  %2130 = vmatpush.bf16.msrb.mxu2 %v3886_v53  ;;  %v3710_v33 = vor.u32 %v4446_v32, %v3709_v31  ;;  %v3407_v31 = vld [vmem:[#allocation8 + $0x2b0] sm:$0xf0] }
  0x75   :  { %2144 = vmatpush.bf16.msrb.mxu3 %v4014_v55  ;;  %v3503_v11 = vld [vmem:[#allocation8 + $0x370] sm:$0xf0] }
  0x76   :  { %2104 = vmatpush.bf16.msra.mxu0 %v3598_v59  ;;  %v3439_v59 = vld [vmem:[#allocation8 + $0x2f0] sm:$0xf0] }
  0x78   :  { %2113 = vmatpush.bf16.msra.mxu1 %v3806_v45  ;;  %2131 = vmatpush.bf16.msrb.mxu2 %v3870_v0  ;;  %v3186_v45 = vor.u32 %v4312_v43, %v3183_v44  ;;  %v179_v0 = vperm.slane %v4905_v34, 4  ;;  %v3311_v43 = vld [vmem:[#allocation8 + $0x1f0] sm:$0xf0] }
  0x79   :  { %2145 = vmatpush.bf16.msrb.mxu3 %v3998_v3  ;;  %v4304_v3 = vld [vmem:[#allocation8 + $0xa4] sm:$0xf] }
  0x7a   :  { %2105 = vmatpush.bf16.msra.mxu0 %v3582_v7 }
  0x7c   :  { %2114 = vmatpush.bf16.msra.mxu1 %v3790_v61  ;;  %2132 = vmatpush.bf16.msrb.mxu2 %v3854_v13 }
  0x7d   :  { %2146 = vmatpush.bf16.msrb.mxu3 %v3982_v15  ;;  %v3154_v15 = vor.u32 %v4304_v3, %v3151_v4  ;;  %v4360_v3 = vld [vmem:[#allocation8 + $0x264] sm:$0xf]  ;;  %v3375_v4 = vld [vmem:[#allocation8 + $0x270] sm:$0xf0] }
  0x80   :  { %2115 = vmatpush.bf16.msra.mxu1 %v3774_v9  ;;  %2133 = vmatpush.bf16.msrb.mxu2 %v3838_v22  ;;  %v3442_v9 = vor.u32 %v4376_v58, %v3439_v59  ;;  %v181_v22 = vperm.slane %v4905_v34, 6  ;;  %v4292_v59 = vld [vmem:[#allocation8 + $0x44] sm:$0xf] }
  0x81   :  { %2147 = vmatpush.bf16.msrb.mxu3 %v3966_v24 }
  0x84   :  { %2116 = vmatpush.bf16.msra.mxu1 %v3758_v18  ;;  %v3551_v18 = vld [vmem:[#allocation8 + $0x3d0] sm:$0xf0] }
  0x85   :  { %v3554_v29 = vor.u32 %v4404_v17, %v3551_v18  ;;  %v4288_v17 = vld [vmem:[#allocation8 + $0x24] sm:$0xf]  ;;  %v3087_v18 = vld [vmem:[#allocation8 + $0x30] sm:$0xf0] }
  0x88   :  { %2117 = vmatpush.bf16.msra.mxu1 %v3742_v27 }
  0x8c   :  { %2118 = vmatpush.bf16.msra.mxu1 %v3726_v30  ;;  %v4368_v30 = vld [vmem:[#allocation8 + $0x2a4] sm:$0xf] }
  0x90   :  { %2119 = vmatpush.bf16.msra.mxu1 %v3710_v33 }
  0xb0   :  { %v369_v35 = vpop.f32.mrf.mxu1 }
  0xb1   :  { %v370_v37 = vadd.f32 %v369_v35, %v175_v36 }
  0xb3   :  { %v472_v47 = vmax.f32 %v370_v37, 0.0  ;;  %v4400_v37 = vld [vmem:[#allocation8 + $0x3a4] sm:$0xf] }
  0xb6   :  { %v397_v38 = vpop.f32.mrf.mxu2 }
  0xb7   :  { %v398_v54 = vadd.f32 %v397_v38, %v177_v46  ;;  %v3535_v38 = vld [vmem:[#allocation8 + $0x3b0] sm:$0xf0] }
  0xb8   :  { %v371_v41 = vpop.f32.mrf.mxu1 }
  0xb9   :  { %v411_v39 = vpop.f32.mrf.mxu3  ;;  %v372_v42 = vadd.f32 %v371_v41, %v175_v36  ;;  %v474_v5 = vmax.f32 %v398_v54, 0.0  ;;  %v3138_v36 = vor.u32 %v4300_v20, %v3135_v21  ;;  %v3119_v41 = vld [vmem:[#allocation8 + $0x70] sm:$0xf0]  ;;  %v4396_v54 = vld [vmem:[#allocation8 + $0x384] sm:$0xf] }
  0xba   :  { %v412_v49 = vadd.f32 %v411_v39, %v178_v40  ;;  %v425_v53 = vpop.f32.mrf.mxu0  ;;  %v4336_v21 = vld [vmem:[#allocation8 + $0x1a4] sm:$0xf] }
  0xbb   :  { %v480_v48 = vmax.f32 %v372_v42, 0.0  ;;  %v426_v14 = vadd.f32 %v425_v53, %v179_v0  ;;  %v4344_v42 = vld [vmem:[#allocation8 + $0x1e4] sm:$0xf]  ;;  %v3391_v53 = vld [vmem:[#allocation8 + $0x290] sm:$0xf0] }
  0xbc   :  { %v475_v60 = vmax.f32 %v412_v49, 0.0  ;;  %v4364_v49 = vld [vmem:[#allocation8 + $0x284] sm:$0xf]  ;;  %v3314_v58 = vor.u32 %v4344_v42, %v3311_v43 }
  0xbd   :  { %v4910_v52 = vpack.c.bf16 %v480_v48, %v472_v47  ;;  %v476_v32 = vmax.f32 %v426_v14, 0.0  ;;  %v3410_v47 = vor.u32 %v4368_v30, %v3407_v31  ;;  %v3538_v48 = vor.u32 %v4400_v37, %v3535_v38  ;;  %v3263_v37 = vld [vmem:[#allocation8 + $0x190] sm:$0xf0]  ;;  %v4352_v42 = vld [vmem:[#allocation8 + $0x224] sm:$0xf] }
  0xbe   :  { %v399_v55 = vpop.f32.mrf.mxu2  ;;  %v3394_v1 = vor.u32 %v4364_v49, %v3391_v53  ;;  %v180_v14 = vperm.slane %v4905_v34, 5  ;;  %v3487_v34 = vld [vmem:[#allocation8 + $0x350] sm:$0xf0]  ;;  %v3090_v31 = vor.u32 %v4288_v17, %v3087_v18  ;;  %v4328_v53 = vld [vmem:[#allocation8 + $0x164] sm:$0xf] }
  0xbf   :  { %2050 = vmatmul.bf16.vlgmr.msrb.gmra.mxu0 %v4910_v52  ;;  %v400_v61 = vadd.f32 %v399_v55, %v177_v46  ;;  %v3519_v55 = vld [vmem:[#allocation8 + $0x390] sm:$0xf0] }
  0xc0   :  { %2154 = vmatpush.bf16.msrb.mxu0 %v3186_v45  ;;  %v383_v63 = vpop.f32.mrf.mxu1  ;;  %v3522_v2 = vor.u32 %v4396_v54, %v3519_v55  ;;  %v3247_v55 = vld [vmem:[#allocation8 + $0x170] sm:$0xf0] }
  0xc1   :  { %v413_v56 = vpop.f32.mrf.mxu3  ;;  %v482_v6 = vmax.f32 %v400_v61, 0.0  ;;  %v384_v24 = vadd.f32 %v383_v63, %v176_v8  ;;  %v4340_v61 = vld [vmem:[#allocation8 + $0x1c4] sm:$0xf] }
  0xc2   :  { %v414_v62 = vadd.f32 %v413_v56, %v178_v40  ;;  %v427_v19 = vpop.f32.mrf.mxu0  ;;  %v4296_v40 = vld [vmem:[#allocation8 + $0x64] sm:$0xf] }
  0xc3   :  { %v4915_v12 = vpack.c.bf16 %v482_v6, %v474_v5  ;;  %v428_v23 = vadd.f32 %v427_v19, %v179_v0  ;;  %v473_v44 = vmax.f32 %v384_v24, 0.0 }
  0xc4   :  { %v483_v7 = vmax.f32 %v414_v62, 0.0  ;;  %2155 = vmatpush.bf16.msrb.mxu0 %v3170_v57  ;;  %v3122_v57 = vor.u32 %v4296_v40, %v3119_v41  ;;  %v3295_v62 = vld [vmem:[#allocation8 + $0x1d0] sm:$0xf0]  ;;  %v4440_v40 = vld [vmem:[#allocation8 + $0x4e4] sm:$0xf] }
  0xc5   :  { %2078 = vmatmul.bf16.vlgmr.msra.gmra.mxu2 %v4915_v12  ;;  %v484_v35 = vmax.f32 %v428_v23, 0.0  ;;  %v3298_v16 = vor.u32 %v4340_v61, %v3295_v62  ;;  %v3378_v23 = vor.u32 %v4360_v3, %v3375_v4  ;;  %v3695_v41 = vld [vmem:[#allocation8 + $0x4f0] sm:$0xf0]  ;;  %v4348_v62 = vld [vmem:[#allocation8 + $0x204] sm:$0xf]  ;;  %v3250_v4 = vor.u32 %v4328_v53, %v3247_v55 }
  0xc6   :  { %v4917_v13 = vpack.c.bf16 %v483_v7, %v475_v60  ;;  %2182 = vmatpush.bf16.msra.mxu2 %v3442_v9  ;;  %v453_v25 = vpop.f32.mrf.mxu2  ;;  %v3103_v60 = vld [vmem:[#allocation8 + $0x50] sm:$0xf0]  ;;  %v3698_v54 = vor.u32 %v4440_v40, %v3695_v41  ;;  %v4424_v41 = vld [vmem:[#allocation8 + $0x464] sm:$0xf] }
  0xc7   :  { %v454_v45 = vadd.f32 %v453_v25, %v181_v22  ;;  %v4923_v51 = vpack.c.bf16 %v484_v35, %v476_v32  ;;  %v4356_v25 = vld [vmem:[#allocation8 + $0x244] sm:$0xf]  ;;  %v3071_v35 = vld [vmem:[#allocation8 + $0x10] sm:$0xf0] }
  0xc8   :  { %2092 = vmatmul.bf16.vlgmr.msra.gmra.mxu3 %v4917_v13  ;;  %2156 = vmatpush.bf16.msrb.mxu0 %v3154_v15  ;;  %v385_v33 = vpop.f32.mrf.mxu1  ;;  %v3106_v15 = vor.u32 %v4292_v59, %v3103_v60  ;;  %v3199_v40 = vld [vmem:[#allocation8 + $0x110] sm:$0xf0] }
  0xc9   :  { %2196 = vmatpush.bf16.msra.mxu3 %v3570_v10  ;;  %v467_v27 = vpop.f32.mrf.mxu3  ;;  %v386_v39 = vadd.f32 %v385_v33, %v176_v8  ;;  %v478_v5 = vmax.f32 %v454_v45, 0.0  ;;  %v4392_v10 = vld [vmem:[#allocation8 + $0x364] sm:$0xf]  ;;  %v4031_v53 = vld [vmem:[#allocation8 + $0x790] sm:$0xf0] }
  0xca   :  { %2183 = vmatpush.bf16.msra.mxu2 %v3426_v28  ;;  %v468_v50 = vadd.f32 %v467_v27, %v182_v26  ;;  %v3506_v24 = vor.u32 %v4392_v10, %v3503_v11  ;;  %v3359_v28 = vld [vmem:[#allocation8 + $0x250] sm:$0xf0]  ;;  %v4284_v33 = vld [vmem:[#allocation8 + $0x4] sm:$0xf] }
  0xcb   :  { %v481_v46 = vmax.f32 %v386_v39, 0.0  ;;  %v3362_v38 = vor.u32 %v4356_v25, %v3359_v28  ;;  %v3074_v45 = vor.u32 %v4284_v33, %v3071_v35  ;;  %v3231_v10 = vld [vmem:[#allocation8 + $0x150] sm:$0xf0]  ;;  %v4320_v25 = vld [vmem:[#allocation8 + $0x124] sm:$0xf] }
  0xcc   :  { %2157 = vmatpush.bf16.msrb.mxu0 %v3138_v36  ;;  %v479_v6 = vmax.f32 %v468_v50, 0.0  ;;  %v4332_v36 = vld [vmem:[#allocation8 + $0x184] sm:$0xf]  ;;  %v3215_v28 = vld [vmem:[#allocation8 + $0x130] sm:$0xf0] }
  0xcd   :  { %2197 = vmatpush.bf16.msra.mxu3 %v3554_v29  ;;  %v4925_v56 = vpack.c.bf16 %v481_v46, %v473_v44  ;;  %v4388_v29 = vld [vmem:[#allocation8 + $0x344] sm:$0xf]  ;;  %v3343_v44 = vld [vmem:[#allocation8 + $0x230] sm:$0xf0]  ;;  %v3266_v50 = vor.u32 %v4332_v36, %v3263_v37  ;;  %v3218_v33 = vor.u32 %v4320_v25, %v3215_v28  ;;  %v3189_v28 = vld [vmem:[#allocation8 + $0xe8] sm:$0xf] }
  0xce   :  { %2184 = vmatpush.bf16.msra.mxu2 %v3410_v47  ;;  %v455_v63 = vpop.f32.mrf.mxu2  ;;  %v3490_v39 = vor.u32 %v4388_v29, %v3487_v34  ;;  %v4384_v46 = vld [vmem:[#allocation8 + $0x324] sm:$0xf]  ;;  %v3471_v47 = vld [vmem:[#allocation8 + $0x330] sm:$0xf0]  ;;  %v3346_v60 = vor.u32 %v4352_v42, %v3343_v44 }
  0xcf   :  { %v456_v7 = vadd.f32 %v455_v63, %v181_v22  ;;  %2064 = vmatmul.bf16.vlgmr.msrb.gmra.mxu1 %v4925_v56  ;;  %2106 = vmatmul.bf16.vlgmr.msra.gmra.mxu0 %v4923_v51  ;;  %v3279_v22 = vld [vmem:[#allocation8 + $0x1b0] sm:$0xf0]  ;;  %v3474_v61 = vor.u32 %v4384_v46, %v3471_v47  ;;  %v4428_v29 = vld [vmem:[#allocation8 + $0x484] sm:$0xf] }
  0xd0   :  { %v439_v9 = vpop.f32.mrf.mxu1  ;;  %2158 = vmatpush.bf16.msrb.mxu0 %v3122_v57  ;;  %2168 = vmatpush.bf16.msrb.mxu1 %v3314_v58  ;;  %v3282_v32 = vor.u32 %v4336_v21, %v3279_v22  ;;  %v4436_v57 = vld [vmem:[#allocation8 + $0x4c4] sm:$0xf]  ;;  %v3679_v58 = vld [vmem:[#allocation8 + $0x4d0] sm:$0xf0] }
  0xd1   :  { %2198 = vmatpush.bf16.msra.mxu3 %v3538_v48  ;;  %v469_v0 = vpop.f32.mrf.mxu3  ;;  %v486_v19 = vmax.f32 %v456_v7, 0.0  ;;  %v440_v30 = vadd.f32 %v439_v9, %v180_v14  ;;  %v3327_v63 = vld [vmem:[#allocation8 + $0x210] sm:$0xf0]  ;;  %v4324_v9 = vld [vmem:[#allocation8 + $0x144] sm:$0xf] }
  0xd2   :  { %v470_v8 = vadd.f32 %v469_v0, %v182_v26  ;;  %2185 = vmatpush.bf16.msra.mxu2 %v3394_v1  ;;  %v4380_v0 = vld [vmem:[#allocation8 + $0x304] sm:$0xf]  ;;  %v3455_v1 = vld [vmem:[#allocation8 + $0x310] sm:$0xf0]  ;;  %v3330_v11 = vor.u32 %v4348_v62, %v3327_v63 }
  0xd3   :  { %v4930_v26 = vpack.c.bf16 %v486_v19, %v478_v5  ;;  %v477_v48 = vmax.f32 %v440_v30, 0.0  ;;  %v3951_v5 = vld [vmem:[#allocation8 + $0x6f0] sm:$0xf0]  ;;  %v4500_v19 = vld [vmem:[#allocation8 + $0x6c4] sm:$0xf] }
  0xd4   :  { %v487_v20 = vmax.f32 %v470_v8, 0.0  ;;  %2159 = vmatpush.bf16.msrb.mxu0 %v3106_v15  ;;  %2169 = vmatpush.bf16.msrb.mxu1 %v3298_v16  ;;  %v4079_v7 = vld [vmem:[#allocation8 + $0x7f0] sm:$0xf0]  ;;  %v3682_v8 = vor.u32 %v4436_v57, %v3679_v58  ;;  %v4432_v15 = vld [vmem:[#allocation8 + $0x4a4] sm:$0xf] }
  0xd5   :  { %2199 = vmatpush.bf16.msra.mxu3 %v3522_v2  ;;  %2134 = vmatmul.bf16.vlgmr.msrb.gmra.mxu2 %v4930_v26  ;;  %v4504_v2 = vld [vmem:[#allocation8 + $0x6e4] sm:$0xf]  ;;  %v3663_v16 = vld [vmem:[#allocation8 + $0x4b0] sm:$0xf0] }
  0xd6   :  { %v4932_v27 = vpack.c.bf16 %v487_v20, %v479_v6  ;;  %2186 = vmatpush.bf16.msra.mxu2 %v3378_v23  ;;  %v4536_v6 = vld [vmem:[#allocation8 + $0x7e4] sm:$0xf]  ;;  %v3954_v17 = vor.u32 %v4504_v2, %v3951_v5  ;;  %v3234_v20 = vor.u32 %v4324_v9, %v3231_v10  ;;  %v3935_v21 = vld [vmem:[#allocation8 + $0x6d0] sm:$0xf0] }
  0xd7   :  { %v4082_v18 = vor.u32 %v4536_v6, %v4079_v7  ;;  %v4532_v22 = vld [vmem:[#allocation8 + $0x7c4] sm:$0xf]  ;;  %v4063_v23 = vld [vmem:[#allocation8 + $0x7d0] sm:$0xf0]  ;;  %v3938_v30 = vor.u32 %v4500_v19, %v3935_v21 }
  0xd8   :  { %2148 = vmatmul.bf16.vlgmr.msrb.gmra.mxu3 %v4932_v27  ;;  %v441_v43 = vpop.f32.mrf.mxu1  ;;  %2160 = vmatpush.bf16.msrb.mxu0 %v3090_v31  ;;  %v3647_v34 = vld [vmem:[#allocation8 + $0x490] sm:$0xf0]  ;;  %v4066_v31 = vor.u32 %v4532_v22, %v4063_v23  ;;  %v4528_v36 = vld [vmem:[#allocation8 + $0x7a4] sm:$0xf] }
  0xd9   :  { %2200 = vmatpush.bf16.msra.mxu3 %v3506_v24  ;;  %2170 = vmatpush.bf16.msrb.mxu1 %v3282_v32  ;;  %v442_v49 = vadd.f32 %v441_v43, %v180_v14  ;;  %v3458_v14 = vor.u32 %v4380_v0, %v3455_v1  ;;  %v3666_v24 = vor.u32 %v4432_v15, %v3663_v16  ;;  %v4496_v32 = vld [vmem:[#allocation8 + $0x6a4] sm:$0xf]  ;;  %v3919_v35 = vld [vmem:[#allocation8 + $0x6b0] sm:$0xf0] }
  0xda   :  { %2187 = vmatpush.bf16.msra.mxu2 %v3362_v38  ;;  %v4047_v37 = vld [vmem:[#allocation8 + $0x7b0] sm:$0xf0]  ;;  %v3650_v38 = vor.u32 %v4428_v29, %v3647_v34  ;;  %v4472_v43 = vld [vmem:[#allocation8 + $0x5e4] sm:$0xf]  ;;  %v3922_v46 = vor.u32 %v4496_v32, %v3919_v35  ;;  %v4315_v29 = vld [vmem:[#allocation8 + $0xf4] sm:$0xf0] }
  0xdb   :  { %v485_v59 = vmax.f32 %v442_v49, 0.0  ;;  %v3631_v42 = vld [vmem:[#allocation8 + $0x470] sm:$0xf0]  ;;  %v4050_v47 = vor.u32 %v4528_v36, %v4047_v37  ;;  %v4420_v57 = vld [vmem:[#allocation8 + $0x444] sm:$0xf]  ;;  %v3190_v36 = vor.u32 %v4315_v29, %v3189_v28 }
  0xdc   :  { %2161 = vmatpush.bf16.msrb.mxu0 %v3074_v45  ;;  %v3823_v44 = vld [vmem:[#allocation8 + $0x5f0] sm:$0xf0]  ;;  %v4488_v63 = vld [vmem:[#allocation8 + $0x664] sm:$0xf]  ;;  %v3125_v29 = vld [vmem:[#allocation8 + $0x68] sm:$0xf] }
  0xdd   :  { %2201 = vmatpush.bf16.msra.mxu3 %v3490_v39  ;;  %v4936_v3 = vpack.c.bf16 %v485_v59, %v477_v48  ;;  %2171 = vmatpush.bf16.msrb.mxu1 %v3266_v50  ;;  %v4316_v39 = vld [vmem:[#allocation8 + $0x104] sm:$0xf]  ;;  %v3903_v45 = vld [vmem:[#allocation8 + $0x690] sm:$0xf0]  ;;  %v3826_v55 = vor.u32 %v4472_v43, %v3823_v44 }
  0xde   :  { %2188 = vmatpush.bf16.msra.mxu2 %v3346_v60  ;;  %v4492_v48 = vld [vmem:[#allocation8 + $0x684] sm:$0xf]  ;;  %v3202_v49 = vor.u32 %v4316_v39, %v3199_v40  ;;  %v3615_v58 = vld [vmem:[#allocation8 + $0x450] sm:$0xf0]  ;;  %v3173_v39 = vld [vmem:[#allocation8 + $0xc8] sm:$0xf] }
  0xdf   :  { %2120 = vmatmul.bf16.vlgmr.msra.gmra.mxu1 %v4936_v3  ;;  %2162 = vmatmul.bf16.vlgmr.msrb.gmra.mxu0 %v4910_v52  ;;  %v4524_v50 = vld [vmem:[#allocation8 + $0x784] sm:$0xf]  ;;  %v3807_v60 = vld [vmem:[#allocation8 + $0x5d0] sm:$0xf0] }
  0xe0   :  { %2210 = vmatpush.bf16.msra.mxu0 %v3698_v54  ;;  %v3634_v54 = vor.u32 %v4424_v41, %v3631_v42  ;;  %v4468_v59 = vld [vmem:[#allocation8 + $0x5c4] sm:$0xf]  ;;  %v4034_v62 = vor.u32 %v4524_v50, %v4031_v53  ;;  %v3887_v0 = vld [vmem:[#allocation8 + $0x670] sm:$0xf0]  ;;  %v4311_v42 = vld [vmem:[#allocation8 + $0xd4] sm:$0xf0] }
  0xe1   :  { %2202 = vmatpush.bf16.msra.mxu3 %v3474_v61  ;;  %2172 = vmatpush.bf16.msrb.mxu1 %v3250_v4  ;;  %v3906_v61 = vor.u32 %v4492_v48, %v3903_v45  ;;  %v4520_v1 = vld [vmem:[#allocation8 + $0x764] sm:$0xf]  ;;  %v4015_v2 = vld [vmem:[#allocation8 + $0x770] sm:$0xf0]  ;;  %v3618_v4 = vor.u32 %v4420_v57, %v3615_v58  ;;  %v3810_v5 = vor.u32 %v4468_v59, %v3807_v60  ;;  %v3445_v48 = vld [vmem:[#allocation8 + $0x2e8] sm:$0xf] }
  0xe2   :  { %2189 = vmatpush.bf16.msra.mxu2 %v3330_v11  ;;  %v4416_v6 = vld [vmem:[#allocation8 + $0x424] sm:$0xf]  ;;  %v3599_v7 = vld [vmem:[#allocation8 + $0x430] sm:$0xf0]  ;;  %v3890_v10 = vor.u32 %v4488_v63, %v3887_v0  ;;  %v4018_v11 = vor.u32 %v4520_v1, %v4015_v2  ;;  %v4379_v45 = vld [vmem:[#allocation8 + $0x2f4] sm:$0xf0] }
  0xe3   :  { %v3791_v9 = vld [vmem:[#allocation8 + $0x5b0] sm:$0xf0]  ;;  %v4516_v16 = vld [vmem:[#allocation8 + $0x744] sm:$0xf]  ;;  %v3573_v50 = vld [vmem:[#allocation8 + $0x3e8] sm:$0xf]  ;;  %v3446_v60 = vor.u32 %v4379_v45, %v3445_v48 }
  0xe4   :  { %2211 = vmatpush.bf16.msra.mxu0 %v3682_v8  ;;  %v4464_v8 = vld [vmem:[#allocation8 + $0x5a4] sm:$0xf]  ;;  %v3871_v15 = vld [vmem:[#allocation8 + $0x650] sm:$0xf0]  ;;  %v4411_v53 = vld [vmem:[#allocation8 + $0x3f4] sm:$0xf0] }
  0xe5   :  { %2203 = vmatpush.bf16.msra.mxu3 %v3458_v14  ;;  %2173 = vmatpush.bf16.msrb.mxu1 %v3234_v20  ;;  %v4484_v14 = vld [vmem:[#allocation8 + $0x644] sm:$0xf]  ;;  %v3794_v19 = vor.u32 %v4464_v8, %v3791_v9  ;;  %v3583_v21 = vld [vmem:[#allocation8 + $0x410] sm:$0xf0]  ;;  %v4307_v63 = vld [vmem:[#allocation8 + $0xb4] sm:$0xf0] }
  0xe6   :  { %2238 = vmatpush.bf16.msrb.mxu2 %v3954_v17  ;;  %v3999_v17 = vld [vmem:[#allocation8 + $0x750] sm:$0xf0]  ;;  %v4412_v20 = vld [vmem:[#allocation8 + $0x404] sm:$0xf]  ;;  %v3429_v0 = vld [vmem:[#allocation8 + $0x2c8] sm:$0xf] }
  0xe7   :  { %2190 = vmatmul.bf16.vlgmr.msra.gmra.mxu2 %v4915_v12  ;;  %v4460_v22 = vld [vmem:[#allocation8 + $0x584] sm:$0xf]  ;;  %v3775_v23 = vld [vmem:[#allocation8 + $0x590] sm:$0xf0]  ;;  %v4002_v25 = vor.u32 %v4516_v16, %v3999_v17  ;;  %v4375_v2 = vld [vmem:[#allocation8 + $0x2d4] sm:$0xf0] }
  0xe8   :  { %2212 = vmatpush.bf16.msra.mxu0 %v3666_v24  ;;  %2204 = vmatmul.bf16.vlgmr.msra.gmra.mxu3 %v4917_v13  ;;  %v3874_v24 = vor.u32 %v4484_v14, %v3871_v15  ;;  %v4480_v34 = vld [vmem:[#allocation8 + $0x624] sm:$0xf]  ;;  %v3983_v32 = vld [vmem:[#allocation8 + $0x730] sm:$0xf0]  ;;  %v3778_v35 = vor.u32 %v4460_v22, %v3775_v23  ;;  %v3430_v9 = vor.u32 %v4375_v2, %v3429_v0  ;;  %v4303_v14 = vld [vmem:[#allocation8 + $0x94] sm:$0xf0] }
  0xe9   :  { %2252 = vmatpush.bf16.msrb.mxu3 %v4082_v18  ;;  %2174 = vmatpush.bf16.msrb.mxu1 %v3218_v33  ;;  %v3602_v18 = vor.u32 %v4416_v6, %v3599_v7  ;;  %v3586_v33 = vor.u32 %v4412_v20, %v3583_v21  ;;  %v4456_v37 = vld [vmem:[#allocation8 + $0x564] sm:$0xf]  ;;  %v3839_v44 = vld [vmem:[#allocation8 + $0x610] sm:$0xf0]  ;;  %v3413_v15 = vld [vmem:[#allocation8 + $0x2a8] sm:$0xf] }
  0xea   :  { %2239 = vmatpush.bf16.msrb.mxu2 %v3938_v30  ;;  %v3855_v30 = vld [vmem:[#allocation8 + $0x630] sm:$0xf0]  ;;  %v4476_v43 = vld [vmem:[#allocation8 + $0x604] sm:$0xf]  ;;  %v4371_v17 = vld [vmem:[#allocation8 + $0x2b4] sm:$0xf0] }
  0xeb   :  { %v3858_v40 = vor.u32 %v4480_v34, %v3855_v30  ;;  %v3743_v57 = vld [vmem:[#allocation8 + $0x550] sm:$0xf0]  ;;  %v3842_v58 = vor.u32 %v4476_v43, %v3839_v44  ;;  %v4448_v6 = vld [vmem:[#allocation8 + $0x524] sm:$0xf]  ;;  %v3317_v23 = vld [vmem:[#allocation8 + $0x1e8] sm:$0xf] }
  0xec   :  { %2213 = vmatpush.bf16.msra.mxu0 %v3650_v38  ;;  %v3759_v38 = vld [vmem:[#allocation8 + $0x570] sm:$0xf0]  ;;  %v4444_v20 = vld [vmem:[#allocation8 + $0x504] sm:$0xf]  ;;  %v4299_v34 = vld [vmem:[#allocation8 + $0x74] sm:$0xf0] }
  0xed   :  { %2253 = vmatpush.bf16.msrb.mxu3 %v4066_v31  ;;  %2175 = vmatpush.bf16.msrb.mxu1 %v3202_v49  ;;  %v4512_v31 = vld [vmem:[#allocation8 + $0x724] sm:$0xf]  ;;  %v3762_v49 = vor.u32 %v4456_v37, %v3759_v38  ;;  %v3727_v7 = vld [vmem:[#allocation8 + $0x530] sm:$0xf0]  ;;  %v3126_v37 = vor.u32 %v4299_v34, %v3125_v29  ;;  %v3301_v38 = vld [vmem:[#allocation8 + $0x1c8] sm:$0xf] }
  0xee   :  { %2240 = vmatpush.bf16.msrb.mxu2 %v3922_v46  ;;  %v3986_v41 = vor.u32 %v4512_v31, %v3983_v32  ;;  %v4508_v46 = vld [vmem:[#allocation8 + $0x704] sm:$0xf]  ;;  %v3730_v16 = vor.u32 %v4448_v6, %v3727_v7  ;;  %v3711_v21 = vld [vmem:[#allocation8 + $0x510] sm:$0xf0]  ;;  %v3397_v31 = vld [vmem:[#allocation8 + $0x288] sm:$0xf] }
  0xef   :  { %v3714_v30 = vor.u32 %v4444_v20, %v3711_v21  ;;  %v4367_v32 = vld [vmem:[#allocation8 + $0x294] sm:$0xf0]  ;;  %v3381_v44 = vld [vmem:[#allocation8 + $0x268] sm:$0xf] }
  0xf0   :  { %2214 = vmatpush.bf16.msra.mxu0 %v3634_v54  ;;  %2176 = vmatmul.bf16.vlgmr.msrb.gmra.mxu1 %v4925_v56  ;;  %v3174_v54 = vor.u32 %v4311_v42, %v3173_v39  ;;  %v4343_v39 = vld [vmem:[#allocation8 + $0x1d4] sm:$0xf0]  ;;  %v3509_v48 = vld [vmem:[#allocation8 + $0x368] sm:$0xf] }
  0xf1   :  { %2254 = vmatpush.bf16.msrb.mxu3 %v4050_v47  ;;  %2224 = vmatpush.bf16.msra.mxu1 %v3826_v55  ;;  %v3967_v47 = vld [vmem:[#allocation8 + $0x710] sm:$0xf0]  ;;  %v4452_v55 = vld [vmem:[#allocation8 + $0x544] sm:$0xf]  ;;  %v4295_v42 = vld [vmem:[#allocation8 + $0x54] sm:$0xf0] }
  0xf2   :  { %2241 = vmatpush.bf16.msrb.mxu2 %v3906_v61  ;;  %v3970_v59 = vor.u32 %v4508_v46, %v3967_v47  ;;  %v3574_v61 = vor.u32 %v4411_v53, %v3573_v50  ;;  %v3746_v1 = vor.u32 %v4452_v55, %v3743_v57  ;;  %v4363_v46 = vld [vmem:[#allocation8 + $0x274] sm:$0xf0]  ;;  %v3302_v47 = vor.u32 %v4343_v39, %v3301_v38  ;;  %v3285_v50 = vld [vmem:[#allocation8 + $0x1a8] sm:$0xf] }
  0xf3   :  { %v4339_v53 = vld [vmem:[#allocation8 + $0x1b4] sm:$0xf0]  ;;  %v3093_v55 = vld [vmem:[#allocation8 + $0x28] sm:$0xf] }
  0xf4   :  { %2215 = vmatpush.bf16.msra.mxu0 %v3618_v4  ;;  %v3557_v4 = vld [vmem:[#allocation8 + $0x3c8] sm:$0xf]  ;;  %v4291_v57 = vld [vmem:[#allocation8 + $0x34] sm:$0xf0] }
  0xf5   :  { %2255 = vmatpush.bf16.msrb.mxu3 %v4034_v62  ;;  %2225 = vmatpush.bf16.msra.mxu1 %v3810_v5  ;;  %v3157_v62 = vld [vmem:[#allocation8 + $0xa8] sm:$0xf]  ;;  %v4407_v5 = vld [vmem:[#allocation8 + $0x3d4] sm:$0xf0]  ;;  %v3094_v0 = vor.u32 %v4291_v57, %v3093_v55 }
  0xf6   :  { %2242 = vmatpush.bf16.msrb.mxu2 %v3890_v10  ;;  %v3158_v8 = vor.u32 %v4307_v63, %v3157_v62  ;;  %v3558_v10 = vor.u32 %v4407_v5, %v3557_v4  ;;  %v3493_v62 = vld [vmem:[#allocation8 + $0x348] sm:$0xf]  ;;  %v4391_v63 = vld [vmem:[#allocation8 + $0x354] sm:$0xf0] }
  0xf7   :  { %v4335_v2 = vld [vmem:[#allocation8 + $0x194] sm:$0xf0]  ;;  %v3077_v5 = vld [vmem:[#allocation8 + $0x8] sm:$0xf] }
  0xf8   :  { %2216 = vmatpush.bf16.msra.mxu0 %v3602_v18  ;;  %v3541_v18 = vld [vmem:[#allocation8 + $0x3a8] sm:$0xf]  ;;  %v4287_v6 = vld [vmem:[#allocation8 + $0x14] sm:$0xf0] }
  0xf9   :  { %2256 = vmatpush.bf16.msrb.mxu3 %v4018_v11  ;;  %2226 = vmatpush.bf16.msra.mxu1 %v3794_v19  ;;  %v3141_v11 = vld [vmem:[#allocation8 + $0x88] sm:$0xf]  ;;  %v4403_v19 = vld [vmem:[#allocation8 + $0x3b4] sm:$0xf0] }
  0xfa   :  { %2243 = vmatpush.bf16.msrb.mxu2 %v3874_v24  ;;  %v3142_v22 = vor.u32 %v4303_v14, %v3141_v11  ;;  %v4347_v24 = vld [vmem:[#allocation8 + $0x1f4] sm:$0xf0]  ;;  %v3542_v28 = vor.u32 %v4403_v19, %v3541_v18  ;;  %v3701_v7 = vld [vmem:[#allocation8 + $0x4e8] sm:$0xf] }
  0xfb   :  { %v4355_v11 = vld [vmem:[#allocation8 + $0x234] sm:$0xf0]  ;;  %v3253_v18 = vld [vmem:[#allocation8 + $0x168] sm:$0xf] }
  0xfc   :  { %2217 = vmatpush.bf16.msra.mxu0 %v3586_v33  ;;  %v3318_v33 = vor.u32 %v4347_v24, %v3317_v23  ;;  %v4331_v19 = vld [vmem:[#allocation8 + $0x174] sm:$0xf0]  ;;  %v3333_v24 = vld [vmem:[#allocation8 + $0x208] sm:$0xf] }
  0xfd   :  { %2257 = vmatpush.bf16.msrb.mxu3 %v4002_v25  ;;  %2227 = vmatpush.bf16.msra.mxu1 %v3778_v35  ;;  %v3414_v25 = vor.u32 %v4371_v17, %v3413_v15  ;;  %v3525_v35 = vld [vmem:[#allocation8 + $0x388] sm:$0xf]  ;;  %v3078_v17 = vor.u32 %v4287_v6, %v3077_v5  ;;  %v4439_v23 = vld [vmem:[#allocation8 + $0x4d4] sm:$0xf0] }
  0xfe   :  { %2244 = vmatpush.bf16.msrb.mxu2 %v3858_v40  ;;  %v3398_v40 = vor.u32 %v4367_v32, %v3397_v31  ;;  %v3477_v15 = vld [vmem:[#allocation8 + $0x328] sm:$0xf]  ;;  %v4383_v34 = vld [vmem:[#allocation8 + $0x314] sm:$0xf0] }
  0xff   :  { %2218 = vmatmul.bf16.vlgmr.msra.gmra.mxu0 %v4923_v51  ;;  %v3461_v29 = vld [vmem:[#allocation8 + $0x308] sm:$0xf]  ;;  %v4507_v32 = vld [vmem:[#allocation8 + $0x6f4] sm:$0xf0] }
 0x100   :  { %2266 = vmatpush.bf16.msrb.mxu0 %v3190_v36  ;;  %v4399_v36 = vld [vmem:[#allocation8 + $0x394] sm:$0xf0]  ;;  %v3957_v31 = vld [vmem:[#allocation8 + $0x6e8] sm:$0xf] }
 0x101   :  { %2258 = vmatpush.bf16.msrb.mxu3 %v3986_v41  ;;  %2228 = vmatpush.bf16.msra.mxu1 %v3762_v49  ;;  %v3109_v41 = vld [vmem:[#allocation8 + $0x48] sm:$0xf]  ;;  %v3526_v43 = vor.u32 %v4399_v36, %v3525_v35  ;;  %v4395_v49 = vld [vmem:[#allocation8 + $0x374] sm:$0xf0] }
 0x102   :  { %2245 = vmatpush.bf16.msrb.mxu2 %v3842_v58  ;;  %v3110_v45 = vor.u32 %v4295_v42, %v3109_v41  ;;  %v3510_v58 = vor.u32 %v4395_v49, %v3509_v48  ;;  %v4539_v35 = vld [vmem:[#allocation8 + $0x7f4] sm:$0xf0]  ;;  %v3237_v36 = vld [vmem:[#allocation8 + $0x148] sm:$0xf]  ;;  %v3958_v41 = vor.u32 %v4507_v32, %v3957_v31 }
 0x103   :  { %v3669_v42 = vld [vmem:[#allocation8 + $0x4a8] sm:$0xf]  ;;  %v4503_v48 = vld [vmem:[#allocation8 + $0x6d4] sm:$0xf0] }
 0x104   :  { %2267 = vmatpush.bf16.msrb.mxu0 %v3174_v54  ;;  %v3382_v54 = vor.u32 %v4363_v46, %v3381_v44  ;;  %v4069_v49 = vld [vmem:[#allocation8 + $0x7c8] sm:$0xf]  ;;  %v4475_v6 = vld [vmem:[#allocation8 + $0x5f4] sm:$0xf0] }
 0x105   :  { %2259 = vmatpush.bf16.msrb.mxu3 %v3970_v59  ;;  %2229 = vmatpush.bf16.msra.mxu1 %v3746_v1  ;;  %v3365_v59 = vld [vmem:[#allocation8 + $0x248] sm:$0xf]  ;;  %v4523_v31 = vld [vmem:[#allocation8 + $0x774] sm:$0xf0] }
 0x106   :  { %2294 = vmatpush.bf16.msra.mxu2 %v3446_v60  ;;  %v4359_v60 = vld [vmem:[#allocation8 + $0x254] sm:$0xf0]  ;;  %v3269_v1 = vld [vmem:[#allocation8 + $0x188] sm:$0xf] }
 0x107   :  { %2246 = vmatmul.bf16.vlgmr.msrb.gmra.mxu2 %v4930_v26  ;;  %v3366_v4 = vor.u32 %v4359_v60, %v3365_v59  ;;  %v3270_v14 = vor.u32 %v4335_v2, %v3269_v1  ;;  %v3653_v57 = vld [vmem:[#allocation8 + $0x488] sm:$0xf]  ;;  %v4319_v2 = vld [vmem:[#allocation8 + $0x114] sm:$0xf0] }
 0x108   :  { %2260 = vmatmul.bf16.vlgmr.msrb.gmra.mxu3 %v4932_v27  ;;  %2268 = vmatpush.bf16.msrb.mxu0 %v3158_v8  ;;  %v3494_v8 = vor.u32 %v4391_v63, %v3493_v62  ;;  %v4499_v62 = vld [vmem:[#allocation8 + $0x6b4] sm:$0xf0]  ;;  %v4053_v63 = vld [vmem:[#allocation8 + $0x7a8] sm:$0xf] }
 0x109   :  { %2308 = vmatpush.bf16.msra.mxu3 %v3574_v61  ;;  %2230 = vmatpush.bf16.msra.mxu1 %v3730_v16  ;;  %v3286_v61 = vor.u32 %v4339_v53, %v3285_v50  ;;  %v4387_v16 = vld [vmem:[#allocation8 + $0x334] sm:$0xf0]  ;;  %v3221_v50 = vld [vmem:[#allocation8 + $0x128] sm:$0xf] }
 0x10a   :  { %2295 = vmatpush.bf16.msra.mxu2 %v3430_v9  ;;  %v4443_v9 = vld [vmem:[#allocation8 + $0x4f4] sm:$0xf0]  ;;  %v3205_v1 = vld [vmem:[#allocation8 + $0x108] sm:$0xf] }
 0x10b   :  { %v3702_v20 = vor.u32 %v4443_v9, %v3701_v7  ;;  %v4323_v53 = vld [vmem:[#allocation8 + $0x134] sm:$0xf0]  ;;  %v3829_v5 = vld [vmem:[#allocation8 + $0x5e8] sm:$0xf] }
 0x10c   :  { %2269 = vmatpush.bf16.msrb.mxu0 %v3142_v22  ;;  %v3685_v22 = vld [vmem:[#allocation8 + $0x4c8] sm:$0xf]  ;;  %v3222_v60 = vor.u32 %v4323_v53, %v3221_v50  ;;  %v4427_v9 = vld [vmem:[#allocation8 + $0x474] sm:$0xf0]  ;;  %v4313_v53 = vld [vmem:[#allocation8 + $0xec] sm:$0xf] }
 0x10d   :  { %2309 = vmatpush.bf16.msra.mxu3 %v3558_v10  ;;  %2231 = vmatpush.bf16.msra.mxu1 %v3714_v30  ;;  %v3349_v10 = vld [vmem:[#allocation8 + $0x228] sm:$0xf]  ;;  %v3254_v30 = vor.u32 %v4331_v19, %v3253_v18  ;;  %v3686_v38 = vor.u32 %v4439_v23, %v3685_v22  ;;  %v4527_v18 = vld [vmem:[#allocation8 + $0x794] sm:$0xf0] }
 0x10e   :  { %2296 = vmatpush.bf16.msra.mxu2 %v3414_v25  ;;  %v3350_v21 = vor.u32 %v4355_v11, %v3349_v10  ;;  %v3478_v25 = vor.u32 %v4387_v16, %v3477_v15  ;;  %v3206_v11 = vor.u32 %v4319_v2, %v3205_v1  ;;  %v4495_v15 = vld [vmem:[#allocation8 + $0x694] sm:$0xf0]  ;;  %v3830_v16 = vor.u32 %v4475_v6, %v3829_v5  ;;  %v3621_v23 = vld [vmem:[#allocation8 + $0x448] sm:$0xf]  ;;  %v3175_v5 = vld [vmem:[#allocation8 + $0xd8] sm:$0xf0] }
 0x10f   :  { %v4415_v50 = vld [vmem:[#allocation8 + $0x414] sm:$0xf0]  ;;  %v3845_v6 = vld [vmem:[#allocation8 + $0x608] sm:$0xf] }
 0x110   :  { %2270 = vmatpush.bf16.msrb.mxu0 %v3126_v37  ;;  %2232 = vmatmul.bf16.vlgmr.msra.gmra.mxu1 %v4936_v3  ;;  %v4327_v37 = vld [vmem:[#allocation8 + $0x154] sm:$0xf0] }
 0x111   :  { %2310 = vmatpush.bf16.msra.mxu3 %v3542_v28  ;;  %2280 = vmatpush.bf16.msrb.mxu1 %v3318_v33  ;;  %v4351_v28 = vld [vmem:[#allocation8 + $0x214] sm:$0xf0]  ;;  %v4085_v33 = vld [vmem:[#allocation8 + $0x7e8] sm:$0xf]  ;;  %v3238_v46 = vor.u32 %v4327_v37, %v3237_v36 }
 0x112   :  { %2297 = vmatpush.bf16.msra.mxu2 %v3398_v40  ;;  %v3334_v39 = vor.u32 %v4351_v28, %v3333_v24  ;;  %v3462_v40 = vor.u32 %v4383_v34, %v3461_v29  ;;  %v4086_v44 = vor.u32 %v4539_v35, %v4085_v33  ;;  %v4423_v24 = vld [vmem:[#allocation8 + $0x454] sm:$0xf0]  ;;  %v3893_v28 = vld [vmem:[#allocation8 + $0x668] sm:$0xf] }
 0x113   :  { %v4491_v29 = vld [vmem:[#allocation8 + $0x674] sm:$0xf0]  ;;  %v3622_v32 = vor.u32 %v4423_v24, %v3621_v23  ;;  %v3797_v33 = vld [vmem:[#allocation8 + $0x5a8] sm:$0xf]  ;;  %v4305_v24 = vld [vmem:[#allocation8 + $0xac] sm:$0xf] }
 0x114   :  { %2271 = vmatpush.bf16.msrb.mxu0 %v3110_v45  ;;  %v4535_v45 = vld [vmem:[#allocation8 + $0x7d4] sm:$0xf0]  ;;  %v3894_v36 = vor.u32 %v4491_v29, %v3893_v28  ;;  %v3605_v37 = vld [vmem:[#allocation8 + $0x428] sm:$0xf] }
 0x115   :  { %2311 = vmatpush.bf16.msra.mxu3 %v3526_v43  ;;  %2281 = vmatpush.bf16.msrb.mxu1 %v3302_v47  ;;  %v4435_v43 = vld [vmem:[#allocation8 + $0x4b4] sm:$0xf0]  ;;  %v3941_v47 = vld [vmem:[#allocation8 + $0x6c8] sm:$0xf]  ;;  %v4070_v59 = vor.u32 %v4535_v45, %v4069_v49 }
 0x116   :  { %2298 = vmatpush.bf16.msra.mxu2 %v3382_v54  ;;  %v3670_v54 = vor.u32 %v4435_v43, %v3669_v42  ;;  %v3942_v55 = vor.u32 %v4503_v48, %v3941_v47  ;;  %v4467_v35 = vld [vmem:[#allocation8 + $0x5b4] sm:$0xf0]  ;;  %v4005_v43 = vld [vmem:[#allocation8 + $0x748] sm:$0xf] }
 0x117   :  { %v3798_v42 = vor.u32 %v4467_v35, %v3797_v33  ;;  %v3781_v47 = vld [vmem:[#allocation8 + $0x588] sm:$0xf]  ;;  %v4463_v48 = vld [vmem:[#allocation8 + $0x594] sm:$0xf0] }
 0x118   :  { %2272 = vmatpush.bf16.msrb.mxu0 %v3094_v0  ;;  %v4531_v0 = vld [vmem:[#allocation8 + $0x7b4] sm:$0xf0]  ;;  %v3589_v45 = vld [vmem:[#allocation8 + $0x408] sm:$0xf] }
 0x119   :  { %2312 = vmatpush.bf16.msra.mxu3 %v3510_v58  ;;  %2282 = vmatpush.bf16.msrb.mxu1 %v3286_v61  ;;  %v4431_v58 = vld [vmem:[#allocation8 + $0x494] sm:$0xf0]  ;;  %v3925_v61 = vld [vmem:[#allocation8 + $0x6a8] sm:$0xf]  ;;  %v4054_v10 = vor.u32 %v4531_v0, %v4053_v63 }
 0x11a   :  { %2299 = vmatpush.bf16.msra.mxu2 %v3366_v4  ;;  %v3654_v4 = vor.u32 %v4431_v58, %v3653_v57  ;;  %v3926_v7 = vor.u32 %v4499_v62, %v3925_v61  ;;  %v3861_v57 = vld [vmem:[#allocation8 + $0x628] sm:$0xf]  ;;  %v4483_v58 = vld [vmem:[#allocation8 + $0x634] sm:$0xf0]  ;;  %v3590_v62 = vor.u32 %v4415_v50, %v3589_v45  ;;  %v4345_v45 = vld [vmem:[#allocation8 + $0x1ec] sm:$0xf] }
 0x11b   :  { %v4515_v61 = vld [vmem:[#allocation8 + $0x734] sm:$0xf0]  ;;  %v3765_v63 = vld [vmem:[#allocation8 + $0x568] sm:$0xf]  ;;  %v3862_v2 = vor.u32 %v4483_v58, %v3861_v57  ;;  %v3319_v50 = vld [vmem:[#allocation8 + $0x1f8] sm:$0xf0] }
 0x11c   :  { %2273 = vmatpush.bf16.msrb.mxu0 %v3078_v17  ;;  %v4037_v17 = vld [vmem:[#allocation8 + $0x788] sm:$0xf]  ;;  %v4459_v0 = vld [vmem:[#allocation8 + $0x574] sm:$0xf0] }
 0x11d   :  { %2313 = vmatpush.bf16.msra.mxu3 %v3494_v8  ;;  %2283 = vmatpush.bf16.msrb.mxu1 %v3270_v14  ;;  %v3637_v8 = vld [vmem:[#allocation8 + $0x468] sm:$0xf]  ;;  %v4451_v35 = vld [vmem:[#allocation8 + $0x534] sm:$0xf0] }
 0x11e   :  { %2300 = vmatpush.bf16.msra.mxu2 %v3350_v21  ;;  %v3909_v14 = vld [vmem:[#allocation8 + $0x688] sm:$0xf]  ;;  %v3638_v19 = vor.u32 %v4427_v9, %v3637_v8  ;;  %v4471_v21 = vld [vmem:[#allocation8 + $0x5d4] sm:$0xf0] }
 0x11f   :  { %2274 = vmatmul.bf16.vlgmr.msrb.gmra.mxu0 %v4910_v52  ;;  %v3910_v22 = vor.u32 %v4495_v15, %v3909_v14  ;;  %v4479_v8 = vld [vmem:[#allocation8 + $0x614] sm:$0xf0]  ;;  %v3973_v9 = vld [vmem:[#allocation8 + $0x708] sm:$0xf]  ;;  %v4377_v14 = vld [vmem:[#allocation8 + $0x2ec] sm:$0xf] }
 0x120   :  { %2322 = vmatpush.bf16.msra.mxu0 %v3702_v20  ;;  %v3813_v20 = vld [vmem:[#allocation8 + $0x5c8] sm:$0xf]  ;;  %v3447_v15 = vld [vmem:[#allocation8 + $0x2f8] sm:$0xf0] }
 0x121   :  { %2314 = vmatpush.bf16.msra.mxu3 %v3478_v25  ;;  %2284 = vmatpush.bf16.msrb.mxu1 %v3254_v30  ;;  %v4038_v25 = vor.u32 %v4527_v18, %v4037_v17  ;;  %v3814_v34 = vor.u32 %v4471_v21, %v3813_v20  ;;  %v4021_v30 = vld [vmem:[#allocation8 + $0x768] sm:$0xf]  ;;  %v3575_v17 = vld [vmem:[#allocation8 + $0x3f8] sm:$0xf0]  ;;  %v3846_v21 = vor.u32 %v4479_v8, %v3845_v6  ;;  %v4361_v8 = vld [vmem:[#allocation8 + $0x26c] sm:$0xf] }
 0x122   :  { %2301 = vmatpush.bf16.msra.mxu2 %v3334_v39  ;;  %v4022_v39 = vor.u32 %v4523_v31, %v4021_v30  ;;  %v3749_v18 = vld [vmem:[#allocation8 + $0x548] sm:$0xf]  ;;  %v3450_v23 = vor.u32 %v4377_v14, %v3447_v15  ;;  %v3431_v30 = vld [vmem:[#allocation8 + $0x2d8] sm:$0xf0]  ;;  %v4405_v31 = vld [vmem:[#allocation8 + $0x3cc] sm:$0xf] }
 0x123   :  { %v3733_v33 = vld [vmem:[#allocation8 + $0x528] sm:$0xf]  ;;  %v3111_v6 = vld [vmem:[#allocation8 + $0x58] sm:$0xf0] }
 0x124   :  { %2323 = vmatpush.bf16.msra.mxu0 %v3686_v38  ;;  %v4419_v38 = vld [vmem:[#allocation8 + $0x434] sm:$0xf0]  ;;  %v3511_v14 = vld [vmem:[#allocation8 + $0x378] sm:$0xf0] }
 0x125   :  { %2315 = vmatpush.bf16.msra.mxu3 %v3462_v40  ;;  %2285 = vmatpush.bf16.msrb.mxu1 %v3238_v46  ;;  %v3877_v40 = vld [vmem:[#allocation8 + $0x648] sm:$0xf]  ;;  %v3606_v46 = vor.u32 %v4419_v38, %v3605_v37  ;;  %v4301_v38 = vld [vmem:[#allocation8 + $0x8c] sm:$0xf] }
 0x126   :  { %2350 = vmatpush.bf16.msrb.mxu2 %v3958_v41  ;;  %v4487_v41 = vld [vmem:[#allocation8 + $0x654] sm:$0xf0] }
 0x127   :  { %2302 = vmatmul.bf16.vlgmr.msra.gmra.mxu2 %v4915_v12  ;;  %v3878_v49 = vor.u32 %v4487_v41, %v3877_v40  ;;  %v3734_v41 = vor.u32 %v4451_v35, %v3733_v33  ;;  %v4285_v33 = vld [vmem:[#allocation8 + $0xc] sm:$0xf]  ;;  %v3079_v35 = vld [vmem:[#allocation8 + $0x18] sm:$0xf0] }
 0x128   :  { %2316 = vmatmul.bf16.vlgmr.msra.gmra.mxu3 %v4917_v13  ;;  %2324 = vmatpush.bf16.msra.mxu0 %v3670_v54 }
 0x129   :  { %2364 = vmatpush.bf16.msrb.mxu3 %v4086_v44  ;;  %2286 = vmatpush.bf16.msrb.mxu1 %v3222_v60  ;;  %v4519_v44 = vld [vmem:[#allocation8 + $0x754] sm:$0xf0]  ;;  %v3989_v60 = vld [vmem:[#allocation8 + $0x728] sm:$0xf] }
 0x12a   :  { %2351 = vmatpush.bf16.msrb.mxu2 %v3942_v55  ;;  %v4006_v54 = vor.u32 %v4519_v44, %v4005_v43  ;;  %v3191_v55 = vld [vmem:[#allocation8 + $0xf8] sm:$0xf0]  ;;  %v4401_v44 = vld [vmem:[#allocation8 + $0x3ac] sm:$0xf] }
 0x12b   :  { %v3194_v1 = vor.u32 %v4313_v53, %v3191_v55  ;;  %v3415_v43 = vld [vmem:[#allocation8 + $0x2b8] sm:$0xf0] }
 0x12c   :  { %2325 = vmatpush.bf16.msra.mxu0 %v3654_v4  ;;  %v4309_v4 = vld [vmem:[#allocation8 + $0xcc] sm:$0xf]  ;;  %v3127_v55 = vld [vmem:[#allocation8 + $0x78] sm:$0xf0] }
 0x12d   :  { %2365 = vmatpush.bf16.msrb.mxu3 %v4070_v59  ;;  %2287 = vmatpush.bf16.msrb.mxu1 %v3206_v11  ;;  %v3782_v59 = vor.u32 %v4463_v48, %v3781_v47  ;;  %v3766_v11 = vor.u32 %v4459_v0, %v3765_v63  ;;  %v3178_v20 = vor.u32 %v4309_v4, %v3175_v5  ;;  %v3717_v47 = vld [vmem:[#allocation8 + $0x508] sm:$0xf]  ;;  %v4447_v48 = vld [vmem:[#allocation8 + $0x514] sm:$0xf0]  ;;  %v3527_v63 = vld [vmem:[#allocation8 + $0x398] sm:$0xf0] }
 0x12e   :  { %2352 = vmatpush.bf16.msrb.mxu2 %v3926_v7  ;;  %v3990_v7 = vor.u32 %v4515_v61, %v3989_v60  ;;  %v3718_v58 = vor.u32 %v4447_v48, %v3717_v47  ;;  %v3399_v60 = vld [vmem:[#allocation8 + $0x298] sm:$0xf0]  ;;  %v3322_v61 = vor.u32 %v4345_v45, %v3319_v50  ;;  %v4293_v5 = vld [vmem:[#allocation8 + $0x4c] sm:$0xf] }
 0x12f   :  { %v3114_v15 = vor.u32 %v4293_v5, %v3111_v6  ;;  %v3255_v47 = vld [vmem:[#allocation8 + $0x178] sm:$0xf0]  ;;  %v4437_v45 = vld [vmem:[#allocation8 + $0x4cc] sm:$0xf] }
 0x130   :  { %2326 = vmatpush.bf16.msra.mxu0 %v3638_v19  ;;  %2288 = vmatmul.bf16.vlgmr.msrb.gmra.mxu1 %v4925_v56  ;;  %v4455_v19 = vld [vmem:[#allocation8 + $0x554] sm:$0xf0]  ;;  %v3687_v50 = vld [vmem:[#allocation8 + $0x4d8] sm:$0xf0] }
 0x131   :  { %2366 = vmatpush.bf16.msrb.mxu3 %v4054_v10  ;;  %2336 = vmatpush.bf16.msra.mxu1 %v3830_v16  ;;  %v4511_v10 = vld [vmem:[#allocation8 + $0x714] sm:$0xf0]  ;;  %v4409_v16 = vld [vmem:[#allocation8 + $0x3ec] sm:$0xf]  ;;  %v3750_v29 = vor.u32 %v4455_v19, %v3749_v18  ;;  %v3239_v5 = vld [vmem:[#allocation8 + $0x158] sm:$0xf0]  ;;  %v3690_v6 = vor.u32 %v4437_v45, %v3687_v50 }
 0x132   :  { %2353 = vmatpush.bf16.msrb.mxu2 %v3910_v22  ;;  %v3974_v22 = vor.u32 %v4511_v10, %v3973_v9  ;;  %v3578_v28 = vor.u32 %v4409_v16, %v3575_v17  ;;  %v3383_v9 = vld [vmem:[#allocation8 + $0x278] sm:$0xf0]  ;;  %v4337_v16 = vld [vmem:[#allocation8 + $0x1ac] sm:$0xf] }
 0x133   :  { %v3287_v17 = vld [vmem:[#allocation8 + $0x1b8] sm:$0xf0]  ;;  %v3386_v18 = vor.u32 %v4361_v8, %v3383_v9  ;;  %v4289_v19 = vld [vmem:[#allocation8 + $0x2c] sm:$0xf] }
 0x134   :  { %2327 = vmatpush.bf16.msra.mxu0 %v3622_v32  ;;  %v3559_v32 = vld [vmem:[#allocation8 + $0x3d8] sm:$0xf0] }
 0x135   :  { %2367 = vmatpush.bf16.msrb.mxu3 %v4038_v25  ;;  %2337 = vmatpush.bf16.msra.mxu1 %v3814_v34  ;;  %v3159_v25 = vld [vmem:[#allocation8 + $0xb8] sm:$0xf0]  ;;  %v4373_v34 = vld [vmem:[#allocation8 + $0x2cc] sm:$0xf]  ;;  %v3562_v40 = vor.u32 %v4405_v31, %v3559_v32 }
 0x136   :  { %2354 = vmatpush.bf16.msrb.mxu2 %v3894_v36  ;;  %v3162_v36 = vor.u32 %v4305_v24, %v3159_v25  ;;  %v3434_v37 = vor.u32 %v4373_v34, %v3431_v30  ;;  %v3290_v24 = vor.u32 %v4337_v16, %v3287_v17  ;;  %v4389_v25 = vld [vmem:[#allocation8 + $0x34c] sm:$0xf]  ;;  %v3271_v31 = vld [vmem:[#allocation8 + $0x198] sm:$0xf0] }
 0x137   :  { %v4333_v30 = vld [vmem:[#allocation8 + $0x18c] sm:$0xf] }
 0x138   :  { %2328 = vmatpush.bf16.msra.mxu0 %v3606_v46  ;;  %v3543_v46 = vld [vmem:[#allocation8 + $0x3b8] sm:$0xf0]  ;;  %v4501_v17 = vld [vmem:[#allocation8 + $0x6cc] sm:$0xf] }
 0x139   :  { %2368 = vmatpush.bf16.msrb.mxu3 %v4022_v39  ;;  %2338 = vmatpush.bf16.msra.mxu1 %v3798_v42  ;;  %v3143_v39 = vld [vmem:[#allocation8 + $0x98] sm:$0xf0]  ;;  %v4369_v42 = vld [vmem:[#allocation8 + $0x2ac] sm:$0xf]  ;;  %v3546_v57 = vor.u32 %v4401_v44, %v3543_v46  ;;  %v3082_v44 = vor.u32 %v4285_v33, %v3079_v35 }
 0x13a   :  { %2355 = vmatpush.bf16.msrb.mxu2 %v3878_v49  ;;  %v3146_v49 = vor.u32 %v4301_v38, %v3143_v39  ;;  %v3418_v53 = vor.u32 %v4369_v42, %v3415_v43  ;;  %v3703_v38 = vld [vmem:[#allocation8 + $0x4f8] sm:$0xf0]  ;;  %v4353_v39 = vld [vmem:[#allocation8 + $0x22c] sm:$0xf] }
 0x13b   :  { %v4385_v42 = vld [vmem:[#allocation8 + $0x32c] sm:$0xf]  ;;  %v3479_v43 = vld [vmem:[#allocation8 + $0x338] sm:$0xf0] }
 0x13c   :  { %2329 = vmatpush.bf16.msra.mxu0 %v3590_v62  ;;  %v4397_v62 = vld [vmem:[#allocation8 + $0x38c] sm:$0xf] }
 0x13d   :  { %2369 = vmatpush.bf16.msrb.mxu3 %v4006_v54  ;;  %2339 = vmatpush.bf16.msra.mxu1 %v3782_v59  ;;  %v4297_v54 = vld [vmem:[#allocation8 + $0x6c] sm:$0xf] }
 0x13e   :  { %2356 = vmatpush.bf16.msrb.mxu2 %v3862_v2  ;;  %v4365_v59 = vld [vmem:[#allocation8 + $0x28c] sm:$0xf]  ;;  %v3130_v0 = vor.u32 %v4297_v54, %v3127_v55  ;;  %v3303_v2 = vld [vmem:[#allocation8 + $0x1d8] sm:$0xf0] }
 0x13f   :  { %2330 = vmatmul.bf16.vlgmr.msra.gmra.mxu0 %v4923_v51  ;;  %v3402_v4 = vor.u32 %v4365_v59, %v3399_v60  ;;  %v4329_v46 = vld [vmem:[#allocation8 + $0x16c] sm:$0xf]  ;;  %v3463_v60 = vld [vmem:[#allocation8 + $0x318] sm:$0xf0] }
 0x140   :  { %2378 = vmatpush.bf16.msrb.mxu0 %v3194_v1  ;;  %v4341_v1 = vld [vmem:[#allocation8 + $0x1cc] sm:$0xf] }
 0x141   :  { %2370 = vmatpush.bf16.msrb.mxu3 %v3990_v7  ;;  %2340 = vmatpush.bf16.msra.mxu1 %v3766_v11  ;;  %v3530_v7 = vor.u32 %v4397_v62, %v3527_v63  ;;  %v3306_v10 = vor.u32 %v4341_v1, %v3303_v2  ;;  %v4393_v11 = vld [vmem:[#allocation8 + $0x36c] sm:$0xf]  ;;  %v3959_v63 = vld [vmem:[#allocation8 + $0x6f8] sm:$0xf0] }
 0x142   :  { %2357 = vmatpush.bf16.msrb.mxu2 %v3846_v21  ;;  %v3514_v21 = vor.u32 %v4393_v11, %v3511_v14  ;;  %v4381_v59 = vld [vmem:[#allocation8 + $0x30c] sm:$0xf]  ;;  %v4087_v2 = vld [vmem:[#allocation8 + $0x7f8] sm:$0xf0] }
 0x143   :  { %v4505_v62 = vld [vmem:[#allocation8 + $0x6ec] sm:$0xf]  ;;  %v3466_v9 = vor.u32 %v4381_v59, %v3463_v60  ;;  %v3671_v14 = vld [vmem:[#allocation8 + $0x4b8] sm:$0xf0] }
 0x144   :  { %2379 = vmatpush.bf16.msrb.mxu0 %v3178_v20  ;;  %v3095_v20 = vld [vmem:[#allocation8 + $0x38] sm:$0xf0]  ;;  %v4433_v11 = vld [vmem:[#allocation8 + $0x4ac] sm:$0xf] }
 0x145   :  { %2371 = vmatpush.bf16.msrb.mxu3 %v3974_v22  ;;  %2341 = vmatpush.bf16.msra.mxu1 %v3750_v29  ;;  %v4357_v22 = vld [vmem:[#allocation8 + $0x24c] sm:$0xf]  ;;  %v4955_v29 = vpop.f32.mrf.mxu0  ;;  %v3098_v34 = vor.u32 %v4289_v19, %v3095_v20  ;;  %v4071_v20 = vld [vmem:[#allocation8 + $0x7d8] sm:$0xf0] }
 0x146   :  { %2406 = vmatpush.bf16.msra.mxu2 %v3450_v23  ;;  %v3367_v23 = vld [vmem:[#allocation8 + $0x258] sm:$0xf0]  ;;  %v4533_v19 = vld [vmem:[#allocation8 + $0x7cc] sm:$0xf] }
 0x147   :  { %2358 = vmatmul.bf16.vlgmr.msrb.gmra.mxu2 %v4930_v26  ;;  %v3370_v32 = vor.u32 %v4357_v22, %v3367_v23  ;;  %v3223_v22 = vld [vmem:[#allocation8 + $0x138] sm:$0xf0]  ;;  %v3674_v23 = vor.u32 %v4433_v11, %v3671_v14 }
 0x148   :  { %2372 = vmatmul.bf16.vlgmr.msrb.gmra.mxu3 %v4932_v27  ;;  %2380 = vmatpush.bf16.msrb.mxu0 %v3162_v36  ;;  %v4441_v36 = vld [vmem:[#allocation8 + $0x4ec] sm:$0xf]  ;;  %v4957_v54 = vpop.f32.mrf.mxu2  ;;  %v3815_v59 = vld [vmem:[#allocation8 + $0x5d8] sm:$0xf0] }
 0x149   :  { %2420 = vmatpush.bf16.msra.mxu3 %v3578_v28  ;;  %2342 = vmatpush.bf16.msra.mxu1 %v3734_v41  ;;  %v3495_v28 = vld [vmem:[#allocation8 + $0x358] sm:$0xf0]  ;;  %v3274_v41 = vor.u32 %v4333_v30, %v3271_v31  ;;  %v3706_v48 = vor.u32 %v4441_v36, %v3703_v38  ;;  %v4497_v30 = vld [vmem:[#allocation8 + $0x6ac] sm:$0xf] }
 0x14a   :  { %2407 = vmatpush.bf16.msra.mxu2 %v3434_v37  ;;  %v3498_v37 = vor.u32 %v4389_v25, %v3495_v28  ;;  %v4429_v25 = vld [vmem:[#allocation8 + $0x48c] sm:$0xf]  ;;  %v3655_v28 = vld [vmem:[#allocation8 + $0x498] sm:$0xf0] }
 0x14b   :  { %v4961_v1 = vpop.f32.mrf.mxu3  ;;  %v3927_v31 = vld [vmem:[#allocation8 + $0x6b8] sm:$0xf0] }
 0x14c   :  { %2381 = vmatpush.bf16.msrb.mxu0 %v3146_v49  ;;  %v4959_v55 = vpop.f32.mrf.mxu1  ;;  %v4055_v36 = vld [vmem:[#allocation8 + $0x7b8] sm:$0xf0] }
 0x14d   :  { %2421 = vmatpush.bf16.msra.mxu3 %v3562_v40  ;;  %2343 = vmatpush.bf16.msra.mxu1 %v3718_v58  ;;  %v3351_v40 = vld [vmem:[#allocation8 + $0x238] sm:$0xf0]  ;;  %v4963_v8 = vpop.f32.mrf.mxu0 }
 0x14e   :  { %2408 = vmatpush.bf16.msra.mxu2 %v3418_v53  ;;  %v3354_v49 = vor.u32 %v4353_v39, %v3351_v40  ;;  %v4349_v53 = vld [vmem:[#allocation8 + $0x20c] sm:$0xf]  ;;  %v3335_v58 = vld [vmem:[#allocation8 + $0x218] sm:$0xf0]  ;;  %v3658_v39 = vor.u32 %v4429_v25, %v3655_v28 }
 0x14f   :  { %v3207_v38 = vld [vmem:[#allocation8 + $0x118] sm:$0xf0]  ;;  %v4473_v40 = vld [vmem:[#allocation8 + $0x5ec] sm:$0xf] }
 0x150   :  { %2382 = vmatpush.bf16.msrb.mxu0 %v3130_v0  ;;  %2344 = vmatmul.bf16.vlgmr.msra.gmra.mxu1 %v4936_v3  ;;  %v4537_v0 = vld [vmem:[#allocation8 + $0x7ec] sm:$0xf]  ;;  %v4966_v33 = vpop.f32.mrf.mxu2 }
 0x151   :  { %2422 = vmatpush.bf16.msra.mxu3 %v3546_v57  ;;  %2392 = vmatpush.bf16.msrb.mxu1 %v3322_v61  ;;  %v3482_v57 = vor.u32 %v4385_v42, %v3479_v43  ;;  %v3258_v61 = vor.u32 %v4329_v46, %v3255_v47  ;;  %v3930_v43 = vor.u32 %v4497_v30, %v3927_v31  ;;  %v3639_v46 = vld [vmem:[#allocation8 + $0x478] sm:$0xf0]  ;;  %v4461_v28 = vld [vmem:[#allocation8 + $0x58c] sm:$0xf] }
 0x152   :  { %2409 = vmatpush.bf16.msra.mxu2 %v3402_v4  ;;  %v4325_v4 = vld [vmem:[#allocation8 + $0x14c] sm:$0xf] }
 0x153   :  { %v3242_v16 = vor.u32 %v4325_v4, %v3239_v5  ;;  %v4972_v42 = vpop.f32.mrf.mxu3  ;;  %v4521_v5 = vld [vmem:[#allocation8 + $0x76c] sm:$0xf] }
 0x154   :  { %2383 = vmatpush.bf16.msrb.mxu0 %v3114_v15  ;;  %v4090_v15 = vor.u32 %v4537_v0, %v4087_v2  ;;  %v4968_v35 = vpop.f32.mrf.mxu1  ;;  %v4489_v0 = vld [vmem:[#allocation8 + $0x66c] sm:$0xf]  ;;  %v3895_v2 = vld [vmem:[#allocation8 + $0x678] sm:$0xf0] }
 0x155   :  { %2423 = vmatpush.bf16.msra.mxu3 %v3530_v7  ;;  %2393 = vmatpush.bf16.msrb.mxu1 %v3306_v10  ;;  %v3338_v7 = vor.u32 %v4349_v53, %v3335_v58  ;;  %v3962_v10 = vor.u32 %v4505_v62, %v3959_v63  ;;  %v4974_v45 = vpop.f32.mrf.mxu0  ;;  %v4039_v53 = vld [vmem:[#allocation8 + $0x798] sm:$0xf0]  ;;  %v4469_v58 = vld [vmem:[#allocation8 + $0x5cc] sm:$0xf] }
 0x156   :  { %2410 = vmatpush.bf16.msra.mxu2 %v3386_v18  ;;  %v3943_v18 = vld [vmem:[#allocation8 + $0x6d8] sm:$0xf0]  ;;  %v3818_v4 = vor.u32 %v4469_v58, %v3815_v59  ;;  %v4413_v31 = vld [vmem:[#allocation8 + $0x40c] sm:$0xf] }
 0x157   :  { %v3623_v62 = vld [vmem:[#allocation8 + $0x458] sm:$0xf0] }
 0x158   :  { %2384 = vmatpush.bf16.msrb.mxu0 %v3098_v34  ;;  %v4976_v11 = vpop.f32.mrf.mxu2 }
 0x159   :  { %2424 = vmatpush.bf16.msra.mxu3 %v3514_v21  ;;  %2394 = vmatpush.bf16.msrb.mxu1 %v3290_v24  ;;  %v4321_v21 = vld [vmem:[#allocation8 + $0x12c] sm:$0xf]  ;;  %v3946_v24 = vor.u32 %v4501_v17, %v3943_v18  ;;  %v3607_v17 = vld [vmem:[#allocation8 + $0x438] sm:$0xf0] }
 0x15a   :  { %2411 = vmatpush.bf16.msra.mxu2 %v3370_v32  ;;  %v3226_v34 = vor.u32 %v4321_v21, %v3223_v22  ;;  %v4529_v32 = vld [vmem:[#allocation8 + $0x7ac] sm:$0xf] }
 0x15b   :  { %v4058_v47 = vor.u32 %v4529_v32, %v4055_v36  ;;  %v4981_v21 = vpop.f32.mrf.mxu3  ;;  %v3591_v32 = vld [vmem:[#allocation8 + $0x418] sm:$0xf0] }
 0x15c   :  { %2385 = vmatpush.bf16.msrb.mxu0 %v3082_v44  ;;  %v4425_v44 = vld [vmem:[#allocation8 + $0x46c] sm:$0xf]  ;;  %v4978_v14 = vpop.f32.mrf.mxu1 }
 0x15d   :  { %2425 = vmatpush.bf16.msra.mxu3 %v3498_v37  ;;  %2395 = vmatpush.bf16.msrb.mxu1 %v3274_v41  ;;  %v4317_v37 = vld [vmem:[#allocation8 + $0x10c] sm:$0xf]  ;;  %v3831_v41 = vld [vmem:[#allocation8 + $0x5f8] sm:$0xf0] }
 0x15e   :  { %2412 = vmatpush.bf16.msra.mxu2 %v3354_v49  ;;  %v3911_v49 = vld [vmem:[#allocation8 + $0x698] sm:$0xf0]  ;;  %v3834_v50 = vor.u32 %v4473_v40, %v3831_v41  ;;  %v4513_v40 = vld [vmem:[#allocation8 + $0x72c] sm:$0xf] }
 0x15f   :  { %2386 = vmatmul.bf16.vlgmr.msrb.gmra.mxu0 %v4910_v52  ;;  %v4074_v52 = vor.u32 %v4533_v19, %v4071_v20  ;;  %v4485_v19 = vld [vmem:[#allocation8 + $0x64c] sm:$0xf]  ;;  %v3879_v20 = vld [vmem:[#allocation8 + $0x658] sm:$0xf0] }
 0x160   :  { %2434 = vmatpush.bf16.msra.mxu0 %v3706_v48  ;;  %v3210_v48 = vor.u32 %v4317_v37, %v3207_v38  ;;  %v3882_v30 = vor.u32 %v4485_v19, %v3879_v20  ;;  %v4481_v37 = vld [vmem:[#allocation8 + $0x62c] sm:$0xf]  ;;  %v3863_v38 = vld [vmem:[#allocation8 + $0x638] sm:$0xf0] }
 0x161   :  { %2426 = vmatpush.bf16.msra.mxu3 %v3482_v57  ;;  %2396 = vmatpush.bf16.msrb.mxu1 %v3258_v61  ;;  %v3642_v57 = vor.u32 %v4425_v44, %v3639_v46  ;;  %v4421_v61 = vld [vmem:[#allocation8 + $0x44c] sm:$0xf]  ;;  %v3991_v41 = vld [vmem:[#allocation8 + $0x738] sm:$0xf0]  ;;  %v3594_v44 = vor.u32 %v4413_v31, %v3591_v32 }
 0x162   :  { %2413 = vmatpush.bf16.msra.mxu2 %v3338_v7  ;;  %v3626_v7 = vor.u32 %v4421_v61, %v3623_v62  ;;  %v4457_v46 = vld [vmem:[#allocation8 + $0x56c] sm:$0xf]  ;;  %v3975_v61 = vld [vmem:[#allocation8 + $0x718] sm:$0xf0] }
 0x163   :  { %v4445_v19 = vld [vmem:[#allocation8 + $0x50c] sm:$0xf] }
 0x164   :  { %2435 = vmatpush.bf16.msra.mxu0 %v3690_v6  ;;  %v4023_v6 = vld [vmem:[#allocation8 + $0x778] sm:$0xf0]  ;;  %v2123_v58 = vpop.f32.mrf.mxu1 }
 0x165   :  { %2427 = vmatpush.bf16.msra.mxu3 %v3466_v9  ;;  %2397 = vmatpush.bf16.msrb.mxu1 %v3242_v16  ;;  %v4465_v9 = vld [vmem:[#allocation8 + $0x5ac] sm:$0xf]  ;;  %v4026_v18 = vor.u32 %v4521_v5, %v4023_v6 }
 0x166   :  { %2462 = vmatpush.bf16.msrb.mxu2 %v3962_v10  ;;  %v3799_v10 = vld [vmem:[#allocation8 + $0x5b8] sm:$0xf0]  ;;  %v4417_v16 = vld [vmem:[#allocation8 + $0x42c] sm:$0xf] }
 0x167   :  { %2414 = vmatmul.bf16.vlgmr.msra.gmra.mxu2 %v4915_v12  ;;  %v4493_v12 = vld [vmem:[#allocation8 + $0x68c] sm:$0xf]  ;;  %v3802_v22 = vor.u32 %v4465_v9, %v3799_v10  ;;  %v3610_v25 = vor.u32 %v4417_v16, %v3607_v17 }
 0x168   :  { %2428 = vmatmul.bf16.vlgmr.msra.gmra.mxu3 %v4917_v13  ;;  %2436 = vmatpush.bf16.msra.mxu0 %v3674_v23  ;;  %v4525_v13 = vld [vmem:[#allocation8 + $0x78c] sm:$0xf]  ;;  %v3914_v60 = vor.u32 %v4493_v12, %v3911_v49  ;;  %v3866_v12 = vor.u32 %v4481_v37, %v3863_v38 }
 0x169   :  { %2476 = vmatpush.bf16.msrb.mxu3 %v4090_v15  ;;  %2398 = vmatpush.bf16.msrb.mxu1 %v3226_v34  ;;  %v4042_v63 = vor.u32 %v4525_v13, %v4039_v53  ;;  %v3898_v15 = vor.u32 %v4489_v0, %v3895_v2  ;;  %v4517_v23 = vld [vmem:[#allocation8 + $0x74c] sm:$0xf]  ;;  %v4983_v34 = vld [vmem:[#allocation10] sm:$0xf]  ;;  %v3847_v53 = vld [vmem:[#allocation8 + $0x618] sm:$0xf0] }
 0x16a   :  { %2463 = vmatpush.bf16.msrb.mxu2 %v3946_v24  ;;  %v4007_v24 = vld [vmem:[#allocation8 + $0x758] sm:$0xf0]  ;;  %v4477_v13 = vld [vmem:[#allocation8 + $0x60c] sm:$0xf] }
 0x16b   :  { %v4010_v36 = vor.u32 %v4517_v23, %v4007_v24  ;;  %v4453_v0 = vld [vmem:[#allocation8 + $0x54c] sm:$0xf]  ;;  %v3751_v2 = vld [vmem:[#allocation8 + $0x558] sm:$0xf0]  ;;  %v3850_v5 = vor.u32 %v4477_v13, %v3847_v53 }
 0x16c   :  { %2437 = vmatpush.bf16.msra.mxu0 %v3658_v39  ;;  %v3754_v10 = vor.u32 %v4453_v0, %v3751_v2  ;;  %v4545_v16 = vld [vmem:[#allocation11 + $0x28] sm:$0xff]  ;;  %v4550_v2 = vld [vmem:[#allocation11 + $0x50] sm:$0xff] }
 0x16d   :  { %2477 = vmatpush.bf16.msrb.mxu3 %v4074_v52  ;;  %2399 = vmatpush.bf16.msrb.mxu1 %v3210_v48  ;;  %v3783_v52 = vld [vmem:[#allocation8 + $0x598] sm:$0xf0] }
 0x16e   :  { %2464 = vmatpush.bf16.msrb.mxu2 %v3930_v43  ;;  %v3786_v39 = vor.u32 %v4461_v28, %v3783_v52  ;;  %v754_v43 = vperm.slane %v4983_v34, 0  ;;  %v4547_v48 = vld [vmem:[#allocation11 + $0x38] sm:$0xff]  ;;  %v755_v28 = vperm.slane %v4983_v34, 1 }
 0x170   :  { %2438 = vmatpush.bf16.msra.mxu0 %v3642_v57  ;;  %2400 = vmatmul.bf16.vlgmr.msrb.gmra.mxu1 %v4925_v56  ;;  %v4985_v56 = vpop.f32.mrf.mxu0  ;;  %v2054_v49 = vadd.f32 %v4963_v8, %v754_v43  ;;  %v2137_v57 = vpop.f32.mrf.mxu2  ;;  %v2052_v62 = vadd.f32 %v4955_v29, %v754_v43  ;;  %v4546_v8 = vld [vmem:[#allocation11 + $0x30] sm:$0xff] }
 0x171   :  { %2478 = vmatpush.bf16.msrb.mxu3 %v4058_v47  ;;  %2448 = vmatpush.bf16.msra.mxu1 %v3834_v50  ;;  %v3767_v47 = vld [vmem:[#allocation8 + $0x578] sm:$0xf0]  ;;  %v3994_v50 = vor.u32 %v4513_v40, %v3991_v41  ;;  %v4553_v41 = vld [vmem:[#allocation11 + $0x68] sm:$0xff] }
 0x172   :  { %2465 = vmatpush.bf16.msrb.mxu2 %v3914_v60  ;;  %v3770_v59 = vor.u32 %v4457_v46, %v3767_v47  ;;  %v4509_v60 = vld [vmem:[#allocation8 + $0x70c] sm:$0xf]  ;;  %v2066_v6 = vadd.f32 %v4959_v55, %v2052_v62 }
 0x174   :  { %2439 = vmatpush.bf16.msra.mxu0 %v3626_v7  ;;  %v3978_v7 = vor.u32 %v4509_v60, %v3975_v61  ;;  %v2080_v17 = vadd.f32 %v4957_v54, %v2066_v6  ;;  %v4551_v60 = vld [vmem:[#allocation11 + $0x58] sm:$0xff] }
 0x175   :  { %2479 = vmatpush.bf16.msrb.mxu3 %v4042_v63  ;;  %2449 = vmatpush.bf16.msra.mxu1 %v3818_v4  ;;  %v2068_v63 = vadd.f32 %v4968_v35, %v2054_v49  ;;  %v2151_v4 = vpop.f32.mrf.mxu3  ;;  %v4449_v35 = vld [vmem:[#allocation8 + $0x52c] sm:$0xf]  ;;  %v4552_v49 = vld [vmem:[#allocation11 + $0x60] sm:$0xff] }
 0x176   :  { %2466 = vmatpush.bf16.msrb.mxu2 %v3898_v15  ;;  %v3735_v15 = vld [vmem:[#allocation8 + $0x538] sm:$0xf0]  ;;  %v2094_v23 = vadd.f32 %v4961_v1, %v2080_v17  ;;  %v4554_v1 = vld [vmem:[#allocation11 + $0x70] sm:$0xff]  ;;  %v4548_v17 = vld [vmem:[#allocation11 + $0x40] sm:$0xff] }
 0x177   :  { %v2082_v29 = vadd.f32 %v4966_v33, %v2068_v63  ;;  %v4544_v33 = vld [vmem:[#allocation11 + $0x20] sm:$0xff] }
 0x178   :  { %2440 = vmatpush.bf16.msra.mxu0 %v3610_v25  ;;  %v2163_v9 = vpop.f32.mrf.mxu0  ;;  %v2191_v20 = vpop.f32.mrf.mxu2 }
 0x179   :  { %2480 = vmatpush.bf16.msrb.mxu3 %v4026_v18  ;;  %2450 = vmatpush.bf16.msra.mxu1 %v3802_v22  ;;  %v3738_v18 = vor.u32 %v4449_v35, %v3735_v15  ;;  %v2096_v55 = vadd.f32 %v4972_v42, %v2082_v29  ;;  %v2177_v22 = vpop.f32.mrf.mxu1  ;;  %v4555_v42 = vld [vmem:[#allocation11 + $0x78] sm:$0xff]  ;;  %v2164_v32 = vadd.f32 %v2163_v9, %v755_v28 }
 0x17a   :  { %2467 = vmatpush.bf16.msrb.mxu2 %v3882_v30  ;;  %v2108_v30 = vadd.f32 %v4974_v45, %v2094_v23  ;;  %v4563_v15 = vld [vmem:[#allocation11 + $0xb8] sm:$0xff]  ;;  %v4558_v23 = vld [vmem:[#allocation11 + $0x90] sm:$0xff] }
 0x17b   :  { %v2110_v25 = vadd.f32 %v4985_v56, %v2096_v55  ;;  %v2178_v38 = vadd.f32 %v2177_v22, %v2164_v32  ;;  %v4560_v22 = vld [vmem:[#allocation11 + $0xa0] sm:$0xff] }
 0x17c   :  { %2441 = vmatpush.bf16.msra.mxu0 %v3594_v44  ;;  %v4541_v44 = vld [vmem:[#allocation11 + $0x8] sm:$0xff] }
 0x17d   :  { %2481 = vmatpush.bf16.msrb.mxu3 %v4010_v36  ;;  %2451 = vmatpush.bf16.msra.mxu1 %v3786_v39  ;;  %v2205_v24 = vpop.f32.mrf.mxu3  ;;  %v2124_v31 = vadd.f32 %v2123_v58, %v2110_v25  ;;  %v4542_v36 = vld [vmem:[#allocation11 + $0x10] sm:$0xff]  ;;  %v2192_v47 = vadd.f32 %v2191_v20, %v2178_v38  ;;  %v4561_v20 = vld [vmem:[#allocation11 + $0xa8] sm:$0xff] }
 0x17e   :  { %2468 = vmatpush.bf16.msrb.mxu2 %v3866_v12 }
 0x17f   :  { %2442 = vmatmul.bf16.vlgmr.msra.gmra.mxu0 %v4923_v51  ;;  %v3719_v51 = vld [vmem:[#allocation8 + $0x518] sm:$0xf0]  ;;  %v2138_v37 = vadd.f32 %v2137_v57, %v2124_v31  ;;  %v2206_v13 = vadd.f32 %v2205_v24, %v2192_v47 }
 0x180   :  { %2762 = vmatpush.bf16.msrb.mxu0 %v4547_v48  ;;  %v3722_v54 = vor.u32 %v4445_v19, %v3719_v51  ;;  %v2165_v52 = vpop.f32.mrf.mxu0  ;;  %v2193_v56 = vpop.f32.mrf.mxu2  ;;  %v4562_v51 = vld [vmem:[#allocation11 + $0xb0] sm:$0xff] }
 0x181   :  { %2482 = vmatpush.bf16.msrb.mxu3 %v3994_v50  ;;  %2452 = vmatpush.bf16.msra.mxu1 %v3770_v59  ;;  %v2179_v39 = vpop.f32.mrf.mxu1  ;;  %v2166_v46 = vadd.f32 %v2165_v52, %v755_v28 }
 0x182   :  { %2469 = vmatpush.bf16.msrb.mxu2 %v3850_v5 }
 0x183   :  { %v2180_v12 = vadd.f32 %v2179_v39, %v2166_v46 }
 0x184   :  { %2763 = vmatpush.bf16.msrb.mxu0 %v4546_v8 }
 0x185   :  { %2483 = vmatpush.bf16.msrb.mxu3 %v3978_v7  ;;  %2453 = vmatpush.bf16.msra.mxu1 %v3754_v10  ;;  %v2207_v45 = vpop.f32.mrf.mxu3  ;;  %v2194_v58 = vadd.f32 %v2193_v56, %v2180_v12  ;;  %v4549_v7 = vld [vmem:[#allocation11 + $0x48] sm:$0xff] }
 0x186   :  { %2470 = vmatmul.bf16.vlgmr.msrb.gmra.mxu2 %v4930_v26  ;;  %v4543_v26 = vld [vmem:[#allocation11 + $0x18] sm:$0xff] }
 0x187   :  { %2790 = vmatpush.bf16.msra.mxu2 %v4563_v15 }
 0x188   :  { %2484 = vmatmul.bf16.vlgmr.msrb.gmra.mxu3 %v4932_v27  ;;  %2764 = vmatpush.bf16.msrb.mxu0 %v4545_v16  ;;  %v2122_v27 = vadd.f32 %v4978_v14, %v2108_v30  ;;  %v2219_v43 = vpop.f32.mrf.mxu0  ;;  %v2152_v14 = vadd.f32 %v2151_v4, %v2138_v37 }
 0x189   :  { %2454 = vmatpush.bf16.msra.mxu1 %v3738_v18  ;;  %v2220_v59 = vadd.f32 %v2219_v43, %v2206_v13 }
 0x18a   :  { %v2136_v40 = vadd.f32 %v4976_v11, %v2122_v27  ;;  %v2494_v50 = vmax.f32 %v2152_v14, 0.0  ;;  %v2247_v53 = vpop.f32.mrf.mxu2 }
 0x18b   :  { %2791 = vmatpush.bf16.msra.mxu2 %v4562_v51 }
 0x18c   :  { %2765 = vmatpush.bf16.msrb.mxu0 %v4544_v33  ;;  %v2150_v48 = vadd.f32 %v4981_v21, %v2136_v40  ;;  %v2208_v21 = vadd.f32 %v2207_v45, %v2194_v58  ;;  %v4559_v33 = vld [vmem:[#allocation11 + $0x98] sm:$0xff] }
 0x18d   :  { %2455 = vmatpush.bf16.msra.mxu1 %v3722_v54  ;;  %v2233_v11 = vpop.f32.mrf.mxu1  ;;  %v2261_v61 = vpop.f32.mrf.mxu3  ;;  %v4557_v54 = vld [vmem:[#allocation11 + $0x88] sm:$0xff]  ;;  %v4571_v58 = vld [vmem:[#allocation11 + $0xf8] sm:$0xff] }
 0x18e   :  { %v2490_v57 = vmax.f32 %v2150_v48, 0.0  ;;  %v2234_v63 = vadd.f32 %v2233_v11, %v2220_v59  ;;  %2804 = vmatpush.bf16.msra.mxu3 %v4571_v58 }
 0x18f   :  { %2792 = vmatpush.bf16.msra.mxu2 %v4561_v20 }
 0x190   :  { %2766 = vmatpush.bf16.msrb.mxu0 %v4543_v26  ;;  %2456 = vmatmul.bf16.vlgmr.msra.gmra.mxu1 %v4936_v3  ;;  %v4540_v3 = vld [vmem:[#allocation11] sm:$0xff]  ;;  %v2498_v62 = vpack.c.bf16 %v2494_v50, %v2490_v57  ;;  %v2221_v0 = vpop.f32.mrf.mxu0  ;;  %v2248_v8 = vadd.f32 %v2247_v53, %v2234_v63  ;;  %v756_v26 = vperm.slane %v4983_v34, 2  ;;  %v4570_v63 = vld [vmem:[#allocation11 + $0xf0] sm:$0xff] }
 0x191   :  { %2776 = vmatpush.bf16.msrb.mxu1 %v4555_v42  ;;  %v2222_v4 = vadd.f32 %v2221_v0, %v2208_v21  ;;  %v4556_v42 = vld [vmem:[#allocation11 + $0x80] sm:$0xff]  ;;  %v4569_v0 = vld [vmem:[#allocation11 + $0xe8] sm:$0xff] }
 0x192   :  { %v2249_v9 = vpop.f32.mrf.mxu2  ;;  %v2262_v10 = vadd.f32 %v2261_v61, %v2248_v8  ;;  %2805 = vmatpush.bf16.msra.mxu3 %v4570_v63  ;;  %v4568_v21 = vld [vmem:[#allocation11 + $0xe0] sm:$0xff] }
 0x193   :  { %2793 = vmatpush.bf16.msra.mxu2 %v4560_v22 }
 0x194   :  { %2767 = vmatpush.bf16.msrb.mxu0 %v4542_v36  ;;  %v2491_v18 = vmax.f32 %v2262_v10, 0.0 }
 0x195   :  { %2777 = vmatpush.bf16.msrb.mxu1 %v4554_v1  ;;  %v2235_v5 = vpop.f32.mrf.mxu1  ;;  %v2263_v35 = vpop.f32.mrf.mxu3 }
 0x196   :  { %v2236_v6 = vadd.f32 %v2235_v5, %v2222_v4  ;;  %2806 = vmatpush.bf16.msra.mxu3 %v4569_v0  ;;  %v4566_v4 = vld [vmem:[#allocation11 + $0xd0] sm:$0xff]  ;;  %v4565_v5 = vld [vmem:[#allocation11 + $0xc8] sm:$0xff] }
 0x197   :  { %2794 = vmatpush.bf16.msra.mxu2 %v4559_v33 }
 0x198   :  { %2768 = vmatpush.bf16.msrb.mxu0 %v4541_v44  ;;  %v2250_v29 = vadd.f32 %v2249_v9, %v2236_v6  ;;  %v4564_v9 = vld [vmem:[#allocation11 + $0xc0] sm:$0xff] }
 0x199   :  { %2778 = vmatpush.bf16.msrb.mxu1 %v4553_v41 }
 0x19a   :  { %v2264_v16 = vadd.f32 %v2263_v35, %v2250_v29  ;;  %2807 = vmatpush.bf16.msra.mxu3 %v4568_v21  ;;  %v757_v29 = vperm.slane %v4983_v34, 3 }
 0x19b   :  { %2795 = vmatpush.bf16.msra.mxu2 %v4558_v23 }
 0x19c   :  { %2769 = vmatpush.bf16.msrb.mxu0 %v4540_v3  ;;  %v2495_v55 = vmax.f32 %v2264_v16, 0.0  ;;  %v2275_v24 = vpop.f32.mrf.mxu0 }
 0x19d   :  { %2779 = vmatpush.bf16.msrb.mxu1 %v4552_v49  ;;  %v2276_v31 = vadd.f32 %v2275_v24, %v756_v26 }
 0x19e   :  { %v2499_v19 = vpack.c.bf16 %v2495_v55, %v2491_v18 }
 0x19f   :  { %2770 = vmatmul.bf16.vlgmr.msrb.gmra.mxu0 %v2498_v62  ;;  %2796 = vmatpush.bf16.msra.mxu2 %v4557_v54 }
 0x1a1   :  { %2780 = vmatpush.bf16.msrb.mxu1 %v4551_v60 }
 0x1a3   :  { %2797 = vmatpush.bf16.msra.mxu2 %v4556_v42 }
 0x1a4   :  { %v2277_v30 = vpop.f32.mrf.mxu0 }
 0x1a5   :  { %2781 = vmatpush.bf16.msrb.mxu1 %v4550_v2  ;;  %v2278_v38 = vadd.f32 %v2277_v30, %v756_v26  ;;  %v4567_v2 = vld [vmem:[#allocation11 + $0xd8] sm:$0xff] }
 0x1a6   :  { %2808 = vmatpush.bf16.msra.mxu3 %v4567_v2 }
 0x1a9   :  { %2782 = vmatpush.bf16.msrb.mxu1 %v4549_v7 }
 0x1aa   :  { %v2303_v25 = vpop.f32.mrf.mxu2  ;;  %2809 = vmatpush.bf16.msra.mxu3 %v4566_v4 }
 0x1ab   :  { %v2317_v52 = vpop.f32.mrf.mxu3 }
 0x1ad   :  { %2783 = vmatpush.bf16.msrb.mxu1 %v4548_v17  ;;  %v2289_v28 = vpop.f32.mrf.mxu1 }
 0x1ae   :  { %v2290_v27 = vadd.f32 %v2289_v28, %v2276_v31  ;;  %2810 = vmatpush.bf16.msra.mxu3 %v4565_v5 }
 0x1b0   :  { %2784 = vmatmul.bf16.vlgmr.msrb.gmra.mxu1 %v2499_v19  ;;  %v2304_v56 = vadd.f32 %v2303_v25, %v2290_v27 }
 0x1b2   :  { %v2305_v32 = vpop.f32.mrf.mxu2  ;;  %v2318_v40 = vadd.f32 %v2317_v52, %v2304_v56  ;;  %2811 = vmatpush.bf16.msra.mxu3 %v4564_v9 }
 0x1b3   :  { %v2319_v36 = vpop.f32.mrf.mxu3 }
 0x1b5   :  { %v2291_v1 = vpop.f32.mrf.mxu1 }
 0x1b6   :  { %v2292_v39 = vadd.f32 %v2291_v1, %v2278_v38 }
 0x1b8   :  { %v2306_v43 = vadd.f32 %v2305_v32, %v2292_v39 }
 0x1ba   :  { %v2320_v48 = vadd.f32 %v2319_v36, %v2306_v43  ;;  %v4577_v43 = vld [vmem:[#allocation13 + $0x28] sm:$0xff] }
 0x1bc   :  { %v2331_v37 = vpop.f32.mrf.mxu0 }
 0x1bd   :  { %v2332_v44 = vadd.f32 %v2331_v37, %v2318_v40 }
 0x1c4   :  { %v2333_v47 = vpop.f32.mrf.mxu0 }
 0x1c5   :  { %v2334_v12 = vadd.f32 %v2333_v47, %v2320_v48  ;;  %v4573_v47 = vld [vmem:[#allocation13 + $0x8] sm:$0xff]  ;;  %v4572_v48 = vld [vmem:[#allocation13] sm:$0xff] }
 0x1ca   :  { %v2359_v41 = vpop.f32.mrf.mxu2 }
 0x1cb   :  { %v2373_v14 = vpop.f32.mrf.mxu3 }
 0x1cd   :  { %v2345_v45 = vpop.f32.mrf.mxu1 }
 0x1ce   :  { %v2346_v46 = vadd.f32 %v2345_v45, %v2332_v44  ;;  %v4578_v45 = vld [vmem:[#allocation13 + $0x30] sm:$0xff]  ;;  %v4576_v44 = vld [vmem:[#allocation13 + $0x20] sm:$0xff] }
 0x1d0   :  { %v2360_v49 = vadd.f32 %v2359_v41, %v2346_v46  ;;  %v4579_v41 = vld [vmem:[#allocation13 + $0x38] sm:$0xff]  ;;  %v4574_v46 = vld [vmem:[#allocation13 + $0x10] sm:$0xff] }
 0x1d1   :  { %2889 = vmatpush.bf16.msra.mxu0 %v4579_v41 }
 0x1d2   :  { %v2361_v13 = vpop.f32.mrf.mxu2  ;;  %v2374_v53 = vadd.f32 %v2373_v14, %v2360_v49  ;;  %v4575_v14 = vld [vmem:[#allocation13 + $0x18] sm:$0xff] }
 0x1d3   :  { %v2375_v57 = vpop.f32.mrf.mxu3 }
 0x1d4   :  { %v2492_v60 = vmax.f32 %v2374_v53, 0.0 }
 0x1d5   :  { %v2347_v3 = vpop.f32.mrf.mxu1  ;;  %2890 = vmatpush.bf16.msra.mxu0 %v4578_v45 }
 0x1d6   :  { %v2348_v50 = vadd.f32 %v2347_v3, %v2334_v12 }
 0x1d8   :  { %v2362_v11 = vadd.f32 %v2361_v13, %v2348_v50  ;;  %v4596_v50 = vld [vmem:[%s5023_s6] ss:$0 sm:$0xff]  ;;  %s4813_s6 = smov [#allocation14]  }
 0x1d9   :  { %2891 = vmatpush.bf16.msra.mxu0 %v4577_v43  ;;  %s2909_s25 = sshll.u32 %s4813_s6, 4  ;;  %s2910_s25 = int_to_ptr.vmem [resolvable:$true] %s2909_s25 }
 0x1da   :  { %v2376_v59 = vadd.f32 %v2375_v57, %v2362_v11 }
 0x1dc   :  { %v2496_v61 = vmax.f32 %v2376_v59, 0.0  ;;  %v2387_v8 = vpop.f32.mrf.mxu0 }
 0x1dd   :  { %v2388_v15 = vadd.f32 %v2387_v8, %v757_v29  ;;  %2892 = vmatpush.bf16.msra.mxu0 %v4576_v44 }
 0x1de   :  { %v2500_v62 = vpack.c.bf16 %v2496_v61, %v2492_v60 }
 0x1e0   :  { %2798 = vmatmul.bf16.vlgmr.msra.gmra.mxu2 %v2500_v62 }
 0x1e1   :  { %2893 = vmatpush.bf16.msra.mxu0 %v4575_v14 }
 0x1e4   :  { %v2389_v35 = vpop.f32.mrf.mxu0 }
 0x1e5   :  { %v2390_v51 = vadd.f32 %v2389_v35, %v757_v29  ;;  %2894 = vmatpush.bf16.msra.mxu0 %v4574_v46 }
 0x1e9   :  { %2895 = vmatpush.bf16.msra.mxu0 %v4573_v47 }
 0x1ea   :  { %v2415_v6 = vpop.f32.mrf.mxu2 }
 0x1eb   :  { %v2429_v10 = vpop.f32.mrf.mxu3 }
 0x1ed   :  { %v2401_v7 = vpop.f32.mrf.mxu1  ;;  %2896 = vmatpush.bf16.msra.mxu0 %v4572_v48 }
 0x1ee   :  { %v2402_v16 = vadd.f32 %v2401_v7, %v2388_v15 }
 0x1f0   :  { %v2416_v20 = vadd.f32 %v2415_v6, %v2402_v16  ;;  %v4597_v6 = vld [vmem:[%s5025_s8] ss:$0 sm:$0xff] }
 0x1f2   :  { %v2417_v17 = vpop.f32.mrf.mxu2  ;;  %v2430_v33 = vadd.f32 %v2429_v10, %v2416_v20 }
 0x1f3   :  { %v2431_v55 = vpop.f32.mrf.mxu3 }
 0x1f5   :  { %v2403_v18 = vpop.f32.mrf.mxu1 }
 0x1f6   :  { %v2404_v22 = vadd.f32 %v2403_v18, %v2390_v51 }
 0x1f8   :  { %v2418_v54 = vadd.f32 %v2417_v17, %v2404_v22 }
 0x1fa   :  { %v2432_v34 = vadd.f32 %v2431_v55, %v2418_v54 }
 0x1fc   :  { %v2443_v19 = vpop.f32.mrf.mxu0 }
 0x1fd   :  { %v2444_v25 = vadd.f32 %v2443_v19, %v2430_v33 }
 0x204   :  { %v2445_v52 = vpop.f32.mrf.mxu0 }
 0x205   :  { %v2446_v26 = vadd.f32 %v2445_v52, %v2432_v34 }
 0x209   :  { %v2471_v23 = vpop.f32.mrf.mxu2 }
 0x20b   :  { %v2485_v28 = vpop.f32.mrf.mxu3 }
 0x20d   :  { %v2457_v24 = vpop.f32.mrf.mxu1 }
 0x20e   :  { %v2458_v42 = vadd.f32 %v2457_v24, %v2444_v25 }
 0x210   :  { %v2472_v30 = vadd.f32 %v2471_v23, %v2458_v42 }
 0x211   :  { %v2473_v32 = vpop.f32.mrf.mxu2 }
 0x212   :  { %v2486_v1 = vadd.f32 %v2485_v28, %v2472_v30 }
 0x213   :  { %v2487_v37 = vpop.f32.mrf.mxu3 }
 0x214   :  { %v2493_v56 = vmax.f32 %v2486_v1, 0.0 }
 0x215   :  { %v2459_v31 = vpop.f32.mrf.mxu1 }
 0x216   :  { %v2460_v27 = vadd.f32 %v2459_v31, %v2446_v26 }
 0x218   :  { %v2474_v36 = vadd.f32 %v2473_v32, %v2460_v27 }
 0x21a   :  { %v2488_v38 = vadd.f32 %v2487_v37, %v2474_v36 }
 0x21c   :  { %v2497_v39 = vmax.f32 %v2488_v38, 0.0  ;;  %v2771_v12 = vpop.f32.mrf.mxu0 }
 0x21d   :  { %v2772_v11 = vadd.f32 %v4596_v50, %v2771_v12 }
 0x21e   :  { %v2501_v40 = vpack.c.bf16 %v2497_v39, %v2493_v56 }
 0x220   :  { %2812 = vmatmul.bf16.vlgmr.msra.gmra.mxu3 %v2501_v40 }
 0x224   :  { %v2773_v13 = vpop.f32.mrf.mxu0 }
 0x225   :  { %v2774_v58 = vadd.f32 %v4596_v50, %v2773_v13 }
 0x22d   :  { %v2785_v49 = vpop.f32.mrf.mxu1 }
 0x22e   :  { %v2786_v59 = vadd.f32 %v2785_v49, %v2772_v11 }
 0x235   :  { %v2787_v57 = vpop.f32.mrf.mxu1 }
 0x236   :  { %v2788_v61 = vadd.f32 %v2787_v57, %v2774_v58 }
 0x263   :  { %v2799_v3 = vpop.f32.mrf.mxu2 }
 0x264   :  { %v2800_v62 = vadd.f32 %v2799_v3, %v2786_v59 }
 0x26b   :  { %v2801_v60 = vpop.f32.mrf.mxu2 }
 0x26c   :  { %v2802_v63 = vadd.f32 %v2801_v60, %v2788_v61 }
 0x2a3   :  { %v2813_v53 = vpop.f32.mrf.mxu3 }
 0x2a4   :  { %v2814_v0 = vadd.f32 %v2813_v53, %v2800_v62 }
 0x2a6   :  { %v2818_v4 = vmax.f32 %v2814_v0, 0.0 }
 0x2ab   :  { %v2815_v21 = vpop.f32.mrf.mxu3 }
 0x2ac   :  { %v2816_v2 = vadd.f32 %v2815_v21, %v2802_v63 }
 0x2ae   :  { %v2819_v8 = vmax.f32 %v2816_v2, 0.0 }
 0x2b0   :  { %v2820_v5 = vpack.c.bf16 %v2819_v8, %v2818_v4 }
 0x2b2   :  { %2897 = vmatmul.bf16.vlgmr.msra.gmra.mxu0 %v2820_v5 }
 0x32f   :  { %v2898_v7 = vpop.f32.mrf.mxu0 }
 0x330   :  { %v2899_v9 = vadd.f32 %v4597_v6, %v2898_v7 }
 0x332   :  { %2903 = vst [vmem:[#allocation14] sm:$0xff] %v2899_v9 }
 0x337   :  { %v2900_v10 = vpop.f32.mrf.mxu0 }
 0x338   :  { %v2901_v29 = vadd.f32 %v4597_v6, %v2900_v10 }
 0x33a   :  { %2904 = vst [vmem:[#allocation14 + $0x8] sm:$0xff] %v2901_v29 }
 0x33b   :  { %2917 = dma.vmem_to_hbm [thread:$0]  %s2910_s25, 256, %s2912_s3, [#allocation4], %s4814_s28, %s4814_s28, %s4815_s29  }
 0x33c   :  { %4798 = dma.done.wait [#allocation4], 256  }
 0x33d   :  { %4799 = vsyncadd [#allocation4], 4294967040 }
 0x33e   :  { %2922 = vsyncpa [#allocation3], 1 }
 0x33f   :  { %2923 = vsyncpa [#allocation6], 1 }
 0x340   :  { %2924 = vsyncpa [#allocation9], 1 }
 0x341   :  { %2925 = vsyncpa [#allocation12], 1 }
 0x342   :  { %2926 = vsyncpa [#allocation4], 1 }

</bundles_post_ra>
